<compile_context>
chip_gen: v6e
topology: v6e:2x2x1
jax: 0.10.0
libtpu: 0.0.40
codegen_flags: <defaults>
</compile_context>

<pallas_src>
import jax
import jax.numpy as jnp
import numpy as np
from jax.experimental import pallas as pl
from jax.experimental.pallas import tpu as pltpu

_EPS = 1e-5          # nn.BatchNorm2d default eps
_LRELU_SLOPE = 0.2   # nn.LeakyReLU(0.2)


# ----------------------------- Pallas kernel -------------------------------

def _fused_disc_kernel(p1_ref, w1_ref, g1_ref, b1_ref,
                       crow_ref, w2c_ref, w2x_ref, shf_ref, g2_ref, b2_ref,
                       w3_ref, w4_ref, bh_ref, sel_ref,
                       cond_ref, uncond_ref):
    rows = p1_ref.shape[0]          # B * 4 * 4
    c1p = g1_ref.shape[1]           # lane-padded down_scale channels
    c2p = g2_ref.shape[1]           # lane-padded joint_conv channels
    ntap = shf_ref.shape[0]         # 9 (3x3 kernel)

    # Broadcast constants hoisted once (JAX does not CSE broadcast_in_dim).
    ones_row = jnp.ones((1, rows), jnp.float32)
    ones_c1 = jnp.ones((c1p, 1), jnp.float32)
    ones_c2 = jnp.ones((c2p, 1), jnp.float32)
    inv_n = 1.0 / rows

    def bn_lrelu(y, gamma, beta):
        # Train-mode BatchNorm over the (batch, h, w) rows; stats via MXU ones-row matmuls.
        mean = jnp.dot(ones_row, y, preferred_element_type=jnp.float32) * inv_n
        yc = y - mean
        var = jnp.dot(ones_row, yc * yc, preferred_element_type=jnp.float32) * inv_n
        z = yc * (jax.lax.rsqrt(var + _EPS) * gamma) + beta
        return jnp.where(z >= 0.0, z, _LRELU_SLOPE * z)

    # ---- down_scale: conv-as-matmul (bf16 MXU) + BN + LeakyReLU(0.2) ----
    y1 = jnp.dot(p1_ref[...], w1_ref[...], preferred_element_type=jnp.float32)
    x_code = bn_lrelu(y1, g1_ref[...], b1_ref[...])                 # (rows, c1p) f32

    # ---- joint_conv: per-tap contributions; spatial taps = shift matmuls in row space ----
    cc = jnp.dot(crow_ref[...], w2c_ref[...],
                 preferred_element_type=jnp.float32)                # (rows, ntap*c2p)
    xx = jnp.dot(x_code.astype(jnp.bfloat16), w2x_ref[...],
                 preferred_element_type=jnp.float32)                # (rows, ntap*c2p)
    s_all = (cc + xx).astype(jnp.bfloat16)                          # bf16 -> single-pass MXU
    # 128-lane-aligned slices (c2p is a multiple of 128): no layout copies.
    taps = [jnp.dot(shf_ref[t], s_all[:, t * c2p:(t + 1) * c2p],
                    preferred_element_type=jnp.float32)
            for t in range(ntap)]
    # Balanced-tree sum: dependency depth ceil(log2(9)) = 4 instead of 9.
    while len(taps) > 1:
        nxt = [taps[i] + taps[i + 1] for i in range(0, len(taps) - 1, 2)]
        if len(taps) % 2:
            nxt.append(taps[-1])
        taps = nxt
    code2 = bn_lrelu(taps[0], g2_ref[...], b2_ref[...])             # (rows, c2p) f32

    # ---- heads: weighted full reductions on the MXU + shared batch-selection + sigmoid ----
    rc = jnp.dot(code2 * w3_ref[...], ones_c2, preferred_element_type=jnp.float32)   # (rows, 1)
    ru = jnp.dot(x_code * w4_ref[...], ones_c1, preferred_element_type=jnp.float32)  # (rows, 1)
    heads = jnp.concatenate([rc, ru], axis=1)                       # (rows, 2)
    logits = jnp.dot(sel_ref[...], heads,
                     preferred_element_type=jnp.float32) + bh_ref[...]               # (B, 2)
    # sigmoid(x) = 0.5 * (tanh(x/2) + 1)  (EUP, no exp overflow)
    sig = 0.5 * (jnp.tanh(0.5 * logits) + 1.0)
    cond_ref[...] = sig[:, 0:1]
    uncond_ref[...] = sig[:, 1:2]


def _vmem_spec():
    return pl.BlockSpec(memory_space=pltpu.MemorySpace.VMEM)


# ------------------------------- host glue ---------------------------------

def _round_up_lanes(n, lanes=128):
    return max(lanes, ((n + lanes - 1) // lanes) * lanes)


def _im2col(x_nhwc, k, stride, pad):
    """Patch extraction (wrapper side, tiny). Flat order per row: (kh, kw, c)."""
    B, H, W, C = x_nhwc.shape
    xp = jnp.pad(x_nhwc, ((0, 0), (pad, pad), (pad, pad), (0, 0)))
    OH = (H + 2 * pad - k) // stride + 1
    OW = (W + 2 * pad - k) // stride + 1
    cols = []
    for kh in range(k):
        for kw in range(k):
            cols.append(xp[:, kh:kh + stride * OH:stride,
                        kw:kw + stride * OW:stride, :])
    patches = jnp.stack(cols, axis=-2)                 # (B, OH, OW, k*k, C)
    return patches.reshape(B * OH * OW, k * k * C)


def _tap_shift_matrices(batch, oh, ow):
    """0/1 shift+mask matrices for the 3x3 / pad=1 joint_conv taps (row space)."""
    rows = batch * oh * ow
    m = np.zeros((9, rows, rows), np.float32)
    for t in range(9):
        kh, kw = divmod(t, 3)
        dh, dw = kh - 1, kw - 1
        for b in range(batch):
            for i in range(oh):
                for j in range(ow):
                    si, sj = i + dh, j + dw
                    if 0 <= si < oh and 0 <= sj < ow:
                        r = (b * oh + i) * ow + j
                        q = (b * oh + si) * ow + sj
                        m[t, r, q] = 1.0
    return m


def _batch_select_matrix(batch, rows_per_batch):
    m = np.zeros((batch, batch * rows_per_batch), np.float32)
    for b in range(batch):
        m[b, b * rows_per_batch:(b + 1) * rows_per_batch] = 1.0
    return m


def init_params(key, disc_dim, gan_emb_dim):
    c1 = disc_dim * 8                  # down_scale output channels (see TODO above)
    c2 = disc_dim * 8                  # joint_conv output channels
    cj = c1 + gan_emb_dim              # joint_conv input channels
    ks = jax.random.split(key, 4)

    def conv_w(k, shape):              # deterministic, fan-in scaled normal
        fan_in = shape[1] * shape[2] * shape[3]
        return jax.random.normal(k, shape, jnp.float32) / jnp.sqrt(float(fan_in))

    return {
        # torch layout (Cout, Cin, KH, KW)
        "w_down":   conv_w(ks[0], (c1, disc_dim, 4, 4)),
        "g_down":   jnp.ones((c1,), jnp.float32),
        "b_down":   jnp.zeros((c1,), jnp.float32),
        "w_joint":  conv_w(ks[1], (c2, cj, 3, 3)),
        "g_joint":  jnp.ones((c2,), jnp.float32),
        "b_joint":  jnp.zeros((c2,), jnp.float32),
        "w_logits": conv_w(ks[2], (1, c2, 4, 4)),
        "b_logits": jnp.zeros((1,), jnp.float32),
        "w_uncond": conv_w(ks[3], (1, c1, 4, 4)),
        "b_uncond": jnp.zeros((1,), jnp.float32),
    }


def discriminator_32x32_forward(params, x_var, c_code):
    """x_var: NCHW (B, disc_dim, 8, 8); c_code: (B, gan_emb_dim). Returns dict of (B,)."""
    B, cin, H, W = x_var.shape
    emb = c_code.shape[1]
    c1 = cin * 8
    c2 = cin * 8
    OH = (H + 2 - 4) // 2 + 1
    OW = (W + 2 - 4) // 2 + 1
    assert OH == 4 and OW == 4, "forward requires the down-scaled map to be 4x4"
    rows = B * OH * OW
    c1p = _round_up_lanes(c1)
    c2p = _round_up_lanes(c2)
    f32, bf16 = jnp.float32, jnp.bfloat16

    # ---- operand preparation (tiny XLA glue; weight re-layouts are one-time-style) ----
    x_nhwc = jnp.transpose(x_var, (0, 2, 3, 1)).astype(f32)
    patches1 = _im2col(x_nhwc, 4, 2, 1).astype(bf16)               # (rows, 16*cin)

    w1 = jnp.transpose(params["w_down"], (2, 3, 1, 0)).reshape(16 * cin, c1)
    w1 = jnp.pad(w1, ((0, 0), (0, c1p - c1))).astype(bf16)
    g1 = jnp.pad(params["g_down"], (0, c1p - c1)).reshape(1, c1p).astype(f32)
    b1 = jnp.pad(params["b_down"], (0, c1p - c1)).reshape(1, c1p).astype(f32)

    # c_code repeated over the 4x4 map -> one row per (b, h, w)
    c_rows = jnp.repeat(c_code.astype(f32), OH * OW, axis=0).astype(bf16)   # (rows, emb)

    # joint_conv weights split into c-code / x-code input parts, per tap, stacked along N
    wj = params["w_joint"]                                          # (c2, emb+c1, 3, 3)
    w2c_parts, w2x_parts = [], []
    for t in range(9):
        kh, kw = divmod(t, 3)
        wc_t = jnp.pad(wj[:, :emb, kh, kw].T, ((0, 0), (0, c2p - c2)))          # (emb, c2p)
        wx_t = jnp.pad(wj[:, emb:, kh, kw].T, ((0, c1p - c1), (0, c2p - c2)))   # (c1p, c2p)
        w2c_parts.append(wc_t)
        w2x_parts.append(wx_t)
    w2c = jnp.concatenate(w2c_parts, axis=1).astype(bf16)           # (emb, 9*c2p)
    w2x = jnp.concatenate(w2x_parts, axis=1).astype(bf16)           # (c1p, 9*c2p)
    g2 = jnp.pad(params["g_joint"], (0, c2p - c2)).reshape(1, c2p).astype(f32)
    b2 = jnp.pad(params["b_joint"], (0, c2p - c2)).reshape(1, c2p).astype(f32)

    # 0/1 shift matrices are exact in bf16 -> single-pass MXU matmuls in the kernel.
    shifts = jnp.asarray(_tap_shift_matrices(B, OH, OW)).astype(bf16)   # (9, rows, rows)
    sel = jnp.asarray(_batch_select_matrix(B, OH * OW))                 # (B, rows)

    # head weights laid out per row (b, h, w), channel-padded; combined head bias (1, 2)
    w3 = jnp.transpose(params["w_logits"][0], (1, 2, 0)).reshape(OH * OW, c2)
    w3 = jnp.tile(jnp.pad(w3, ((0, 0), (0, c2p - c2))), (B, 1)).astype(f32)     # (rows, c2p)
    w4 = jnp.transpose(params["w_uncond"][0], (1, 2, 0)).reshape(OH * OW, c1)
    w4 = jnp.tile(jnp.pad(w4, ((0, 0), (0, c1p - c1))), (B, 1)).astype(f32)     # (rows, c1p)
    bias_heads = jnp.concatenate(
        [params["b_logits"], params["b_uncond"]]).reshape(1, 2).astype(f32)

    cond, uncond = pl.pallas_call(
        _fused_disc_kernel,
        out_shape=(jax.ShapeDtypeStruct((B, 1), f32),
                   jax.ShapeDtypeStruct((B, 1), f32)),
        in_specs=[_vmem_spec() for _ in range(14)],
        out_specs=(_vmem_spec(), _vmem_spec()),
    )(patches1, w1, g1, b1, c_rows, w2c, w2x, shifts, g2, b2,
      w3, w4, bias_heads, sel)

    return {"cond": cond.reshape(-1), "uncond": uncond.reshape(-1)}


# --------------------------------- main -------------------------------------

if __name__ == "__main__":
    disc_dim, gan_emb_dim, batch = 4, 16, 2
    key = jax.random.PRNGKey(0)
    kx, kc, kp = jax.random.split(key, 3)

    # The forward requires the down-scaled map to be 4x4 (c_code is repeated 4x4),
    # so x_var is 8x8 spatial with disc_dim channels.
    x_var = jax.random.normal(kx, (batch, disc_dim, 8, 8), jnp.float32)
    c_code = jax.random.normal(kc, (batch, gan_emb_dim), jnp.float32)
    params = init_params(kp, disc_dim, gan_emb_dim)

    forward = jax.jit(discriminator_32x32_forward)
    out = forward(params, x_var, c_code)
    out = jax.block_until_ready(out)

    assert out["cond"].shape == (batch,) and out["uncond"].shape == (batch,)
    assert bool(jnp.all(jnp.isfinite(out["cond"]))) and bool(jnp.all(jnp.isfinite(out["uncond"])))
    assert bool(jnp.all((out["cond"] > 0) & (out["cond"] < 1)))
    assert bool(jnp.all((out["uncond"] > 0) & (out["uncond"] < 1)))
    print("KERNEL_OK")
</pallas_src>

<mosaic_0001>
module attributes {stable_mosaic.version = 11 : i64} {
  func.func @_fused_disc_kernel(%arg0: memref<32x64xbf16, #tpu.memory_space<vmem>>, %arg1: memref<64x128xbf16, #tpu.memory_space<vmem>>, %arg2: memref<1x128xf32, #tpu.memory_space<vmem>>, %arg3: memref<1x128xf32, #tpu.memory_space<vmem>>, %arg4: memref<32x16xbf16, #tpu.memory_space<vmem>>, %arg5: memref<16x1152xbf16, #tpu.memory_space<vmem>>, %arg6: memref<128x1152xbf16, #tpu.memory_space<vmem>>, %arg7: memref<9x32x32xbf16, #tpu.memory_space<vmem>>, %arg8: memref<1x128xf32, #tpu.memory_space<vmem>>, %arg9: memref<1x128xf32, #tpu.memory_space<vmem>>, %arg10: memref<32x128xf32, #tpu.memory_space<vmem>>, %arg11: memref<32x128xf32, #tpu.memory_space<vmem>>, %arg12: memref<1x2xf32, #tpu.memory_space<vmem>>, %arg13: memref<2x32xf32, #tpu.memory_space<vmem>>, %arg14: memref<2x1xf32, #tpu.memory_space<vmem>>, %arg15: memref<2x1xf32, #tpu.memory_space<vmem>>) attributes {dimension_semantics = [], scalar_prefetch = 0 : i64, scratch_operands = 0 : i64, tpu.core_type = #tpu.core_type<tc>} {
    %cst = arith.constant 1.000000e+00 : f32
    %0 = vector.broadcast %cst : f32 to vector<1x32xf32>
    %cst_0 = arith.constant 1.000000e+00 : f32
    %1 = vector.broadcast %cst_0 : f32 to vector<128x1xf32>
    %cst_1 = arith.constant 1.000000e+00 : f32
    %2 = vector.broadcast %cst_1 : f32 to vector<128x1xf32>
    %c0 = arith.constant 0 : index
    %c0_2 = arith.constant 0 : index
    %3 = vector.load %arg0[%c0, %c0_2] : memref<32x64xbf16, #tpu.memory_space<vmem>>, vector<32x64xbf16>
    %c0_3 = arith.constant 0 : index
    %c0_4 = arith.constant 0 : index
    %4 = vector.load %arg1[%c0_3, %c0_4] : memref<64x128xbf16, #tpu.memory_space<vmem>>, vector<64x128xbf16>
    %cst_5 = arith.constant dense<0.000000e+00> : vector<32x128xf32>
    %5 = tpu.matmul %3, %4, %cst_5 {dimension_numbers = #tpu.dot_dimension_numbers<[1], [0], [0], [1], [0, 0, 1, 1], [], []>} : vector<32x64xbf16>, vector<64x128xbf16>, vector<32x128xf32> -> vector<32x128xf32>
    %c0_6 = arith.constant 0 : index
    %c0_7 = arith.constant 0 : index
    %6 = vector.load %arg2[%c0_6, %c0_7] : memref<1x128xf32, #tpu.memory_space<vmem>>, vector<1x128xf32>
    %c0_8 = arith.constant 0 : index
    %c0_9 = arith.constant 0 : index
    %7 = vector.load %arg3[%c0_8, %c0_9] : memref<1x128xf32, #tpu.memory_space<vmem>>, vector<1x128xf32>
    %cst_10 = arith.constant dense<0.000000e+00> : vector<1x128xf32>
    %8 = tpu.matmul %0, %5, %cst_10 {dimension_numbers = #tpu.dot_dimension_numbers<[1], [0], [0], [1], [0, 0, 1, 1], [], []>} : vector<1x32xf32>, vector<32x128xf32>, vector<1x128xf32> -> vector<1x128xf32>
    %cst_11 = arith.constant 3.125000e-02 : f32
    %9 = vector.broadcast %cst_11 : f32 to vector<1x128xf32>
    %10 = arith.mulf %8, %9 : vector<1x128xf32>
    %11 = vector.broadcast %10 : vector<1x128xf32> to vector<32x128xf32>
    %12 = arith.subf %5, %11 : vector<32x128xf32>
    %13 = arith.mulf %12, %12 : vector<32x128xf32>
    %cst_12 = arith.constant dense<0.000000e+00> : vector<1x128xf32>
    %14 = tpu.matmul %0, %13, %cst_12 {dimension_numbers = #tpu.dot_dimension_numbers<[1], [0], [0], [1], [0, 0, 1, 1], [], []>} : vector<1x32xf32>, vector<32x128xf32>, vector<1x128xf32> -> vector<1x128xf32>
    %cst_13 = arith.constant 3.125000e-02 : f32
    %15 = vector.broadcast %cst_13 : f32 to vector<1x128xf32>
    %16 = arith.mulf %14, %15 : vector<1x128xf32>
    %cst_14 = arith.constant 9.99999974E-6 : f32
    %17 = vector.broadcast %cst_14 : f32 to vector<1x128xf32>
    %18 = arith.addf %16, %17 : vector<1x128xf32>
    %19 = math.rsqrt %18 : vector<1x128xf32>
    %20 = arith.mulf %19, %6 : vector<1x128xf32>
    %21 = vector.broadcast %20 : vector<1x128xf32> to vector<32x128xf32>
    %22 = arith.mulf %12, %21 : vector<32x128xf32>
    %23 = vector.broadcast %7 : vector<1x128xf32> to vector<32x128xf32>
    %24 = arith.addf %22, %23 : vector<32x128xf32>
    %cst_15 = arith.constant 0.000000e+00 : f32
    %25 = vector.broadcast %cst_15 : f32 to vector<32x128xf32>
    %26 = arith.cmpf oge, %24, %25 : vector<32x128xf32>
    %cst_16 = arith.constant 2.000000e-01 : f32
    %27 = vector.broadcast %cst_16 : f32 to vector<32x128xf32>
    %28 = arith.mulf %27, %24 : vector<32x128xf32>
    %29 = arith.select %26, %24, %28 : vector<32x128xi1>, vector<32x128xf32>
    %c0_17 = arith.constant 0 : index
    %c0_18 = arith.constant 0 : index
    %30 = vector.load %arg4[%c0_17, %c0_18] : memref<32x16xbf16, #tpu.memory_space<vmem>>, vector<32x16xbf16>
    %c0_19 = arith.constant 0 : index
    %c0_20 = arith.constant 0 : index
    %31 = vector.load %arg5[%c0_19, %c0_20] : memref<16x1152xbf16, #tpu.memory_space<vmem>>, vector<16x1152xbf16>
    %cst_21 = arith.constant dense<0.000000e+00> : vector<32x1152xf32>
    %32 = tpu.matmul %30, %31, %cst_21 {dimension_numbers = #tpu.dot_dimension_numbers<[1], [0], [0], [1], [0, 0, 1, 1], [], []>} : vector<32x16xbf16>, vector<16x1152xbf16>, vector<32x1152xf32> -> vector<32x1152xf32>
    %33 = arith.truncf %29 : vector<32x128xf32> to vector<32x128xbf16>
    %c0_22 = arith.constant 0 : index
    %c0_23 = arith.constant 0 : index
    %34 = vector.load %arg6[%c0_22, %c0_23] : memref<128x1152xbf16, #tpu.memory_space<vmem>>, vector<128x1152xbf16>
    %cst_24 = arith.constant dense<0.000000e+00> : vector<32x1152xf32>
    %35 = tpu.matmul %33, %34, %cst_24 {dimension_numbers = #tpu.dot_dimension_numbers<[1], [0], [0], [1], [0, 0, 1, 1], [], []>} : vector<32x128xbf16>, vector<128x1152xbf16>, vector<32x1152xf32> -> vector<32x1152xf32>
    %36 = arith.addf %32, %35 : vector<32x1152xf32>
    %37 = arith.truncf %36 : vector<32x1152xf32> to vector<32x1152xbf16>
    %c0_25 = arith.constant 0 : index
    %c0_26 = arith.constant 0 : index
    %c0_27 = arith.constant 0 : index
    %38 = vector.load %arg7[%c0_25, %c0_26, %c0_27] : memref<9x32x32xbf16, #tpu.memory_space<vmem>>, vector<1x32x32xbf16>
    %39 = vector.shape_cast %38 : vector<1x32x32xbf16> to vector<32x32xbf16>
    %40 = vector.extract_strided_slice %37 {offsets = [0, 0], sizes = [32, 128], strides = [1, 1]} : vector<32x1152xbf16> to vector<32x128xbf16>
    %cst_28 = arith.constant dense<0.000000e+00> : vector<32x128xf32>
    %41 = tpu.matmul %39, %40, %cst_28 {dimension_numbers = #tpu.dot_dimension_numbers<[1], [0], [0], [1], [0, 0, 1, 1], [], []>} : vector<32x32xbf16>, vector<32x128xbf16>, vector<32x128xf32> -> vector<32x128xf32>
    %c1 = arith.constant 1 : index
    %c0_29 = arith.constant 0 : index
    %c0_30 = arith.constant 0 : index
    %42 = vector.load %arg7[%c1, %c0_29, %c0_30] : memref<9x32x32xbf16, #tpu.memory_space<vmem>>, vector<1x32x32xbf16>
    %43 = vector.shape_cast %42 : vector<1x32x32xbf16> to vector<32x32xbf16>
    %44 = vector.extract_strided_slice %37 {offsets = [0, 128], sizes = [32, 128], strides = [1, 1]} : vector<32x1152xbf16> to vector<32x128xbf16>
    %cst_31 = arith.constant dense<0.000000e+00> : vector<32x128xf32>
    %45 = tpu.matmul %43, %44, %cst_31 {dimension_numbers = #tpu.dot_dimension_numbers<[1], [0], [0], [1], [0, 0, 1, 1], [], []>} : vector<32x32xbf16>, vector<32x128xbf16>, vector<32x128xf32> -> vector<32x128xf32>
    %c2 = arith.constant 2 : index
    %c0_32 = arith.constant 0 : index
    %c0_33 = arith.constant 0 : index
    %46 = vector.load %arg7[%c2, %c0_32, %c0_33] : memref<9x32x32xbf16, #tpu.memory_space<vmem>>, vector<1x32x32xbf16>
    %47 = vector.shape_cast %46 : vector<1x32x32xbf16> to vector<32x32xbf16>
    %48 = vector.extract_strided_slice %37 {offsets = [0, 256], sizes = [32, 128], strides = [1, 1]} : vector<32x1152xbf16> to vector<32x128xbf16>
    %cst_34 = arith.constant dense<0.000000e+00> : vector<32x128xf32>
    %49 = tpu.matmul %47, %48, %cst_34 {dimension_numbers = #tpu.dot_dimension_numbers<[1], [0], [0], [1], [0, 0, 1, 1], [], []>} : vector<32x32xbf16>, vector<32x128xbf16>, vector<32x128xf32> -> vector<32x128xf32>
    %c3 = arith.constant 3 : index
    %c0_35 = arith.constant 0 : index
    %c0_36 = arith.constant 0 : index
    %50 = vector.load %arg7[%c3, %c0_35, %c0_36] : memref<9x32x32xbf16, #tpu.memory_space<vmem>>, vector<1x32x32xbf16>
    %51 = vector.shape_cast %50 : vector<1x32x32xbf16> to vector<32x32xbf16>
    %52 = vector.extract_strided_slice %37 {offsets = [0, 384], sizes = [32, 128], strides = [1, 1]} : vector<32x1152xbf16> to vector<32x128xbf16>
    %cst_37 = arith.constant dense<0.000000e+00> : vector<32x128xf32>
    %53 = tpu.matmul %51, %52, %cst_37 {dimension_numbers = #tpu.dot_dimension_numbers<[1], [0], [0], [1], [0, 0, 1, 1], [], []>} : vector<32x32xbf16>, vector<32x128xbf16>, vector<32x128xf32> -> vector<32x128xf32>
    %c4 = arith.constant 4 : index
    %c0_38 = arith.constant 0 : index
    %c0_39 = arith.constant 0 : index
    %54 = vector.load %arg7[%c4, %c0_38, %c0_39] : memref<9x32x32xbf16, #tpu.memory_space<vmem>>, vector<1x32x32xbf16>
    %55 = vector.shape_cast %54 : vector<1x32x32xbf16> to vector<32x32xbf16>
    %56 = vector.extract_strided_slice %37 {offsets = [0, 512], sizes = [32, 128], strides = [1, 1]} : vector<32x1152xbf16> to vector<32x128xbf16>
    %cst_40 = arith.constant dense<0.000000e+00> : vector<32x128xf32>
    %57 = tpu.matmul %55, %56, %cst_40 {dimension_numbers = #tpu.dot_dimension_numbers<[1], [0], [0], [1], [0, 0, 1, 1], [], []>} : vector<32x32xbf16>, vector<32x128xbf16>, vector<32x128xf32> -> vector<32x128xf32>
    %c5 = arith.constant 5 : index
    %c0_41 = arith.constant 0 : index
    %c0_42 = arith.constant 0 : index
    %58 = vector.load %arg7[%c5, %c0_41, %c0_42] : memref<9x32x32xbf16, #tpu.memory_space<vmem>>, vector<1x32x32xbf16>
    %59 = vector.shape_cast %58 : vector<1x32x32xbf16> to vector<32x32xbf16>
    %60 = vector.extract_strided_slice %37 {offsets = [0, 640], sizes = [32, 128], strides = [1, 1]} : vector<32x1152xbf16> to vector<32x128xbf16>
    %cst_43 = arith.constant dense<0.000000e+00> : vector<32x128xf32>
    %61 = tpu.matmul %59, %60, %cst_43 {dimension_numbers = #tpu.dot_dimension_numbers<[1], [0], [0], [1], [0, 0, 1, 1], [], []>} : vector<32x32xbf16>, vector<32x128xbf16>, vector<32x128xf32> -> vector<32x128xf32>
    %c6 = arith.constant 6 : index
    %c0_44 = arith.constant 0 : index
    %c0_45 = arith.constant 0 : index
    %62 = vector.load %arg7[%c6, %c0_44, %c0_45] : memref<9x32x32xbf16, #tpu.memory_space<vmem>>, vector<1x32x32xbf16>
    %63 = vector.shape_cast %62 : vector<1x32x32xbf16> to vector<32x32xbf16>
    %64 = vector.extract_strided_slice %37 {offsets = [0, 768], sizes = [32, 128], strides = [1, 1]} : vector<32x1152xbf16> to vector<32x128xbf16>
    %cst_46 = arith.constant dense<0.000000e+00> : vector<32x128xf32>
    %65 = tpu.matmul %63, %64, %cst_46 {dimension_numbers = #tpu.dot_dimension_numbers<[1], [0], [0], [1], [0, 0, 1, 1], [], []>} : vector<32x32xbf16>, vector<32x128xbf16>, vector<32x128xf32> -> vector<32x128xf32>
    %c7 = arith.constant 7 : index
    %c0_47 = arith.constant 0 : index
    %c0_48 = arith.constant 0 : index
    %66 = vector.load %arg7[%c7, %c0_47, %c0_48] : memref<9x32x32xbf16, #tpu.memory_space<vmem>>, vector<1x32x32xbf16>
    %67 = vector.shape_cast %66 : vector<1x32x32xbf16> to vector<32x32xbf16>
    %68 = vector.extract_strided_slice %37 {offsets = [0, 896], sizes = [32, 128], strides = [1, 1]} : vector<32x1152xbf16> to vector<32x128xbf16>
    %cst_49 = arith.constant dense<0.000000e+00> : vector<32x128xf32>
    %69 = tpu.matmul %67, %68, %cst_49 {dimension_numbers = #tpu.dot_dimension_numbers<[1], [0], [0], [1], [0, 0, 1, 1], [], []>} : vector<32x32xbf16>, vector<32x128xbf16>, vector<32x128xf32> -> vector<32x128xf32>
    %c8 = arith.constant 8 : index
    %c0_50 = arith.constant 0 : index
    %c0_51 = arith.constant 0 : index
    %70 = vector.load %arg7[%c8, %c0_50, %c0_51] : memref<9x32x32xbf16, #tpu.memory_space<vmem>>, vector<1x32x32xbf16>
    %71 = vector.shape_cast %70 : vector<1x32x32xbf16> to vector<32x32xbf16>
    %72 = vector.extract_strided_slice %37 {offsets = [0, 1024], sizes = [32, 128], strides = [1, 1]} : vector<32x1152xbf16> to vector<32x128xbf16>
    %cst_52 = arith.constant dense<0.000000e+00> : vector<32x128xf32>
    %73 = tpu.matmul %71, %72, %cst_52 {dimension_numbers = #tpu.dot_dimension_numbers<[1], [0], [0], [1], [0, 0, 1, 1], [], []>} : vector<32x32xbf16>, vector<32x128xbf16>, vector<32x128xf32> -> vector<32x128xf32>
    %74 = arith.addf %41, %45 : vector<32x128xf32>
    %75 = arith.addf %49, %53 : vector<32x128xf32>
    %76 = arith.addf %57, %61 : vector<32x128xf32>
    %77 = arith.addf %65, %69 : vector<32x128xf32>
    %78 = arith.addf %74, %75 : vector<32x128xf32>
    %79 = arith.addf %76, %77 : vector<32x128xf32>
    %80 = arith.addf %78, %79 : vector<32x128xf32>
    %81 = arith.addf %80, %73 : vector<32x128xf32>
    %c0_53 = arith.constant 0 : index
    %c0_54 = arith.constant 0 : index
    %82 = vector.load %arg8[%c0_53, %c0_54] : memref<1x128xf32, #tpu.memory_space<vmem>>, vector<1x128xf32>
    %c0_55 = arith.constant 0 : index
    %c0_56 = arith.constant 0 : index
    %83 = vector.load %arg9[%c0_55, %c0_56] : memref<1x128xf32, #tpu.memory_space<vmem>>, vector<1x128xf32>
    %cst_57 = arith.constant dense<0.000000e+00> : vector<1x128xf32>
    %84 = tpu.matmul %0, %81, %cst_57 {dimension_numbers = #tpu.dot_dimension_numbers<[1], [0], [0], [1], [0, 0, 1, 1], [], []>} : vector<1x32xf32>, vector<32x128xf32>, vector<1x128xf32> -> vector<1x128xf32>
    %cst_58 = arith.constant 3.125000e-02 : f32
    %85 = vector.broadcast %cst_58 : f32 to vector<1x128xf32>
    %86 = arith.mulf %84, %85 : vector<1x128xf32>
    %87 = vector.broadcast %86 : vector<1x128xf32> to vector<32x128xf32>
    %88 = arith.subf %81, %87 : vector<32x128xf32>
    %89 = arith.mulf %88, %88 : vector<32x128xf32>
    %cst_59 = arith.constant dense<0.000000e+00> : vector<1x128xf32>
    %90 = tpu.matmul %0, %89, %cst_59 {dimension_numbers = #tpu.dot_dimension_numbers<[1], [0], [0], [1], [0, 0, 1, 1], [], []>} : vector<1x32xf32>, vector<32x128xf32>, vector<1x128xf32> -> vector<1x128xf32>
    %cst_60 = arith.constant 3.125000e-02 : f32
    %91 = vector.broadcast %cst_60 : f32 to vector<1x128xf32>
    %92 = arith.mulf %90, %91 : vector<1x128xf32>
    %cst_61 = arith.constant 9.99999974E-6 : f32
    %93 = vector.broadcast %cst_61 : f32 to vector<1x128xf32>
    %94 = arith.addf %92, %93 : vector<1x128xf32>
    %95 = math.rsqrt %94 : vector<1x128xf32>
    %96 = arith.mulf %95, %82 : vector<1x128xf32>
    %97 = vector.broadcast %96 : vector<1x128xf32> to vector<32x128xf32>
    %98 = arith.mulf %88, %97 : vector<32x128xf32>
    %99 = vector.broadcast %83 : vector<1x128xf32> to vector<32x128xf32>
    %100 = arith.addf %98, %99 : vector<32x128xf32>
    %cst_62 = arith.constant 0.000000e+00 : f32
    %101 = vector.broadcast %cst_62 : f32 to vector<32x128xf32>
    %102 = arith.cmpf oge, %100, %101 : vector<32x128xf32>
    %cst_63 = arith.constant 2.000000e-01 : f32
    %103 = vector.broadcast %cst_63 : f32 to vector<32x128xf32>
    %104 = arith.mulf %103, %100 : vector<32x128xf32>
    %105 = arith.select %102, %100, %104 : vector<32x128xi1>, vector<32x128xf32>
    %c0_64 = arith.constant 0 : index
    %c0_65 = arith.constant 0 : index
    %106 = vector.load %arg10[%c0_64, %c0_65] : memref<32x128xf32, #tpu.memory_space<vmem>>, vector<32x128xf32>
    %107 = arith.mulf %105, %106 : vector<32x128xf32>
    %cst_66 = arith.constant dense<0.000000e+00> : vector<32x1xf32>
    %108 = tpu.matmul %107, %2, %cst_66 {dimension_numbers = #tpu.dot_dimension_numbers<[1], [0], [0], [1], [0, 0, 1, 1], [], []>} : vector<32x128xf32>, vector<128x1xf32>, vector<32x1xf32> -> vector<32x1xf32>
    %c0_67 = arith.constant 0 : index
    %c0_68 = arith.constant 0 : index
    %109 = vector.load %arg11[%c0_67, %c0_68] : memref<32x128xf32, #tpu.memory_space<vmem>>, vector<32x128xf32>
    %110 = arith.mulf %29, %109 : vector<32x128xf32>
    %cst_69 = arith.constant dense<0.000000e+00> : vector<32x1xf32>
    %111 = tpu.matmul %110, %1, %cst_69 {dimension_numbers = #tpu.dot_dimension_numbers<[1], [0], [0], [1], [0, 0, 1, 1], [], []>} : vector<32x128xf32>, vector<128x1xf32>, vector<32x1xf32> -> vector<32x1xf32>
    %112 = tpu.concatenate %108, %111 in 1 : vector<32x1xf32>, vector<32x1xf32> -> vector<32x2xf32>
    %c0_70 = arith.constant 0 : index
    %c0_71 = arith.constant 0 : index
    %113 = vector.load %arg13[%c0_70, %c0_71] : memref<2x32xf32, #tpu.memory_space<vmem>>, vector<2x32xf32>
    %cst_72 = arith.constant dense<0.000000e+00> : vector<2x2xf32>
    %114 = tpu.matmul %113, %112, %cst_72 {dimension_numbers = #tpu.dot_dimension_numbers<[1], [0], [0], [1], [0, 0, 1, 1], [], []>} : vector<2x32xf32>, vector<32x2xf32>, vector<2x2xf32> -> vector<2x2xf32>
    %c0_73 = arith.constant 0 : index
    %c0_74 = arith.constant 0 : index
    %115 = vector.load %arg12[%c0_73, %c0_74] : memref<1x2xf32, #tpu.memory_space<vmem>>, vector<1x2xf32>
    %116 = vector.broadcast %115 : vector<1x2xf32> to vector<2x2xf32>
    %117 = arith.addf %114, %116 : vector<2x2xf32>
    %cst_75 = arith.constant 5.000000e-01 : f32
    %118 = vector.broadcast %cst_75 : f32 to vector<2x2xf32>
    %119 = arith.mulf %118, %117 : vector<2x2xf32>
    %120 = math.tanh %119 : vector<2x2xf32>
    %cst_76 = arith.constant 1.000000e+00 : f32
    %121 = vector.broadcast %cst_76 : f32 to vector<2x2xf32>
    %122 = arith.addf %120, %121 : vector<2x2xf32>
    %cst_77 = arith.constant 5.000000e-01 : f32
    %123 = vector.broadcast %cst_77 : f32 to vector<2x2xf32>
    %124 = arith.mulf %123, %122 : vector<2x2xf32>
    %125 = vector.extract_strided_slice %124 {offsets = [0, 0], sizes = [2, 1], strides = [1, 1]} : vector<2x2xf32> to vector<2x1xf32>
    %c0_78 = arith.constant 0 : index
    %c0_79 = arith.constant 0 : index
    %126 = vector.load %arg14[%c0_78, %c0_79] : memref<2x1xf32, #tpu.memory_space<vmem>>, vector<2x1xf32>
    tpu.vector_store %arg14[%c0_78, %c0_79], %125 {strides = array<i32>} : memref<2x1xf32, #tpu.memory_space<vmem>>, vector<2x1xf32>,
    %127 = vector.extract_strided_slice %124 {offsets = [0, 1], sizes = [2, 1], strides = [1, 1]} : vector<2x2xf32> to vector<2x1xf32>
    %c0_80 = arith.constant 0 : index
    %c0_81 = arith.constant 0 : index
    %128 = vector.load %arg15[%c0_80, %c0_81] : memref<2x1xf32, #tpu.memory_space<vmem>>, vector<2x1xf32>
    tpu.vector_store %arg15[%c0_80, %c0_81], %127 {strides = array<i32>} : memref<2x1xf32, #tpu.memory_space<vmem>>, vector<2x1xf32>,
    return
  }
}

</mosaic_0001>

<bundles_post_ra>
// kernel: discriminator_32x32_forward.1
= control target key start
LH: loop header
LB: loop body
LE: loop exit
PB: predicated region body
PF: predicated region fallthrough
CT: control target
= control target key end

     0   :  { %vm96_vm0 = vcmask 523264   ;;  %v3246_v6 = vmov 0.0   ;;  %vm3247_vm1 = vmmov 0   ;;  %vm154_vm2 = vcmask 261120   ;;  %s3250_s23 = smov 1   ;;  %s4039_s1 = inlined_call_operand.vmem [shape: bf16[64,128], index: 1, kind: input, shape index: {}]   ;;  %s4040_s0 = inlined_call_operand.vmem [shape: bf16[32,64], index: 0, kind: input, shape index: {}]   ;;  %s4041_s6 = inlined_call_operand.vmem [shape: bf16[128,1152], index: 6, kind: input, shape index: {}]   ;;  %s4042_s5 = inlined_call_operand.vmem [shape: bf16[16,1152], index: 5, kind: input, shape index: {}]   ;;  %s4043_s4 = inlined_call_operand.vmem [shape: bf16[32,16], index: 4, kind: input, shape index: {}]   ;;  %s4044_s2 = inlined_call_operand.vmem [shape: f32[1,128], index: 2, kind: input, shape index: {}]   ;;  %s4045_s3 = inlined_call_operand.vmem [shape: f32[1,128], index: 3, kind: input, shape index: {}]   ;;  %s4046_s7 = inlined_call_operand.vmem [shape: bf16[9,32,32], index: 7, kind: input, shape index: {}]   ;;  %s4047_s11 = inlined_call_operand.vmem [shape: f32[32,128], index: 11, kind: input, shape index: {}]   ;;  %s4048_s8 = inlined_call_operand.vmem [shape: f32[1,128], index: 8, kind: input, shape index: {}]   ;;  %s4049_s9 = inlined_call_operand.vmem [shape: f32[1,128], index: 9, kind: input, shape index: {}]   ;;  %s4050_s10 = inlined_call_operand.vmem [shape: f32[32,128], index: 10, kind: input, shape index: {}]   ;;  %s4051_s13 = inlined_call_operand.vmem [shape: f32[2,32], index: 13, kind: input, shape index: {}]   ;;  %s4052_s12 = inlined_call_operand.vmem [shape: f32[1,2], index: 12, kind: input, shape index: {}]   ;;  %s4053_s14 = inlined_call_operand.vmem [shape: f32[2,1], index: 14, kind: output, shape index: {0}]   ;;  %s4054_s15 = inlined_call_operand.vmem [shape: f32[2,1], index: 15, kind: output, shape index: {1}]  }
   0x1   :  { %v3097_v0 = vld [vmem:[%s4039_s1 + $0x18] sm:$0xff]   ;;  %v3098_v1 = vld [vmem:[%s4039_s1 + $0x10] sm:$0xff]   ;;  %v3099_v2 = vld [vmem:[%s4039_s1 + $0x8] sm:$0xff]   ;;  %2862 = vmatprep.subr.mxu1 %v3246_v6  ;;  %2870 = vmatprep.mubr.msk.f32.mxu1 %vm3247_vm1, %v3246_v6  ;;  %v3248_v11 = vmov 1.0   ;;  %v229_v14 = vlaneseq  ;;  %v3249_v60 = vmov 0   ;;  %vm1126_vm7 = vcmask 130048  }
   0x2   :  { %2850 = vmatprep.subr.bf16.mxu0 %v3097_v0  ;;  %v3101_v3 = vld [vmem:[%s4040_s0] sm:$0xff]   ;;  %v3102_v5 = vld [vmem:[%s4040_s0 + $0x8] sm:$0xff]   ;;  %v3103_v12 = vld [vmem:[%s4041_s6 + $0x1f8] ss:$36 sps:$4 sm:$0xff]   ;;  %vm2448_vm12 = vcmask 7168   ;;  %vm2538_vm13 = vcmask 1024  }
   0x3   :  { %2851 = vmatpush3.bf16.msra.mxu0 %v3097_v0  ;;  %2858 = vmatprep.mubr.msk.bf16.mxu0 %vm96_vm0, %v3101_v3  ;;  %v3100_v4 = vld [vmem:[%s4039_s1] sm:$0xff]   ;;  %v230_v15 = vshrl.u32 %v229_v14, 7  ;;  %v3111_v31 = vld [vmem:[%s4041_s6 + $0x1b4] ss:$36 sps:$4 sm:$0xff]   ;;  %v3117_v35 = vld [vmem:[%s4041_s6 + $0x16c] ss:$36 sps:$4 sm:$0xff]  }
   0x4   :  { %2852 = vmatprep.subr.bf16.mxu0 %v3098_v1  ;;  %v3105_v13 = vld [vmem:[%s4041_s6 + $0x1fc] ss:$36 sps:$4 sm:$0xff]   ;;  %v3108_v28 = vld [vmem:[%s4041_s6 + $0x204] ss:$36 sps:$4 sm:$0xff]   ;;  %v3109_v33 = vld [vmem:[%s4041_s6 + $0x1b0] ss:$36 sps:$4 sm:$0xff]  }
   0x5   :  { %v3367_v16 = vsub.s32 0, %v230_v15  ;;  %v3106_v30 = vld [vmem:[%s4041_s6 + $0x200] ss:$36 sps:$4 sm:$0xff]   ;;  %v3112_v34 = vld [vmem:[%s4041_s6 + $0x1b8] ss:$36 sps:$4 sm:$0xff]  }
   0x6   :  { %v3114_v32 = vld [vmem:[%s4041_s6 + $0x1bc] ss:$36 sps:$4 sm:$0xff]   ;;  %v3120_v36 = vld [vmem:[%s4041_s6 + $0x174] ss:$36 sps:$4 sm:$0xff]   ;;  %v3115_v37 = vld [vmem:[%s4041_s6 + $0x168] ss:$36 sps:$4 sm:$0xff]  }
   0x7   :  { %2853 = vmatpush3.bf16.msra.mxu0 %v3098_v1  ;;  %v3118_v38 = vld [vmem:[%s4041_s6 + $0x170] ss:$36 sps:$4 sm:$0xff]   ;;  %v3123_v39 = vld [vmem:[%s4041_s6 + $0x124] ss:$36 sps:$4 sm:$0xff]   ;;  %v3129_v43 = vld [vmem:[%s4041_s6 + $0xdc] ss:$36 sps:$4 sm:$0xff]  }
   0x8   :  { %2854 = vmatprep.subr.bf16.mxu0 %v3099_v2  ;;  %v3126_v40 = vld [vmem:[%s4041_s6 + $0x12c] ss:$36 sps:$4 sm:$0xff]   ;;  %v3121_v41 = vld [vmem:[%s4041_s6 + $0x120] ss:$36 sps:$4 sm:$0xff]   ;;  %v3127_v45 = vld [vmem:[%s4041_s6 + $0xd8] ss:$36 sps:$4 sm:$0xff]  }
   0x9   :  { %v3124_v42 = vld [vmem:[%s4041_s6 + $0x128] ss:$36 sps:$4 sm:$0xff]   ;;  %v3130_v46 = vld [vmem:[%s4041_s6 + $0xe0] ss:$36 sps:$4 sm:$0xff]   ;;  %v3135_v47 = vld [vmem:[%s4041_s6 + $0x94] ss:$36 sps:$4 sm:$0xff]  }
   0xa   :  { %v3132_v44 = vld [vmem:[%s4041_s6 + $0xe4] ss:$36 sps:$4 sm:$0xff]   ;;  %v3138_v48 = vld [vmem:[%s4041_s6 + $0x9c] ss:$36 sps:$4 sm:$0xff]   ;;  %v3133_v49 = vld [vmem:[%s4041_s6 + $0x90] ss:$36 sps:$4 sm:$0xff]  }
   0xb   :  { %2855 = vmatpush3.bf16.msra.mxu0 %v3099_v2  ;;  %v3136_v50 = vld [vmem:[%s4041_s6 + $0x98] ss:$36 sps:$4 sm:$0xff]   ;;  %v3139_v51 = vld [vmem:[%s4041_s6 + $0x48] ss:$36 sps:$4 sm:$0xff]   ;;  %v3142_v53 = vld [vmem:[%s4041_s6 + $0x50] ss:$36 sps:$4 sm:$0xff]  }
   0xc   :  { %2856 = vmatprep.subr.bf16.mxu0 %v3100_v4  ;;  %v3141_v52 = vld [vmem:[%s4041_s6 + $0x4c] ss:$36 sps:$4 sm:$0xff]   ;;  %v3144_v54 = vld [vmem:[%s4041_s6 + $0x54] ss:$36 sps:$4 sm:$0xff]   ;;  %v3147_v55 = vld [vmem:[%s4041_s6 + $0x4] ss:$36 sps:$4 sm:$0xff]  }
   0xd   :  { %v3150_v56 = vld [vmem:[%s4041_s6 + $0xc] ss:$36 sps:$4 sm:$0xff]   ;;  %v3145_v57 = vld [vmem:[%s4041_s6] ss:$36 sps:$4 sm:$0xff]   ;;  %v3156_v61 = vld [vmem:[%s4041_s6 + $0x214] ss:$36 sps:$4 sm:$0xff]  }
   0xe   :  { %v3148_v58 = vld [vmem:[%s4041_s6 + $0x8] ss:$36 sps:$4 sm:$0xff]   ;;  %v152_v2 = vld [vmem:[%s4044_s2] sm:$0x1] }
   0xf   :  { %2857 = vmatpush3.bf16.msra.mxu0 %v3100_v4  ;;  %v3153_v59 = vld [vmem:[%s4041_s6 + $0x20c] ss:$36 sps:$4 sm:$0xff]  }
  0x10   :  { %809 = vmatprep.subr.bf16.mxu0 %v3105_v13 }
  0x12   :  { %2859 = vmatmul.mubr.msk.bf16.vlgmr.msra.gmra.mxu0 %vm96_vm0, %v3102_v5 }
  0x13   :  { %810 = vmatpush1.bf16.msra.mxu0 %v3103_v12  ;;  %841 = vmatprep.mubr.bf16.mxu0 %v3249_v60 }
  0x14   :  { %811 = vmatprep.subr.bf16.mxu0 %v3111_v31  ;;  %v3165_v31 = vld [vmem:[%s4041_s6 + $0x17c] ss:$36 sps:$4 sm:$0xff]  }
  0x17   :  { %812 = vmatpush1.bf16.msra.mxu0 %v3109_v33 }
  0x18   :  { %813 = vmatprep.subr.bf16.mxu0 %v3117_v35  ;;  %v3163_v35 = vld [vmem:[%s4041_s6 + $0x178] ss:$36 sps:$4 sm:$0xff]  }
  0x1b   :  { %814 = vmatpush1.bf16.msra.mxu0 %v3115_v37 }
  0x1c   :  { %815 = vmatprep.subr.bf16.mxu0 %v3123_v39  ;;  %v3174_v39 = vld [vmem:[%s4041_s6 + $0x13c] ss:$36 sps:$4 sm:$0xff]  }
  0x1f   :  { %816 = vmatpush1.bf16.msra.mxu0 %v3121_v41  ;;  %v3172_v41 = vld [vmem:[%s4041_s6 + $0x138] ss:$36 sps:$4 sm:$0xff]  }
  0x20   :  { %817 = vmatprep.subr.bf16.mxu0 %v3129_v43  ;;  %v3180_v43 = vld [vmem:[%s4041_s6 + $0xf4] ss:$36 sps:$4 sm:$0xff]  }
  0x23   :  { %818 = vmatpush1.bf16.msra.mxu0 %v3127_v45  ;;  %v3178_v45 = vld [vmem:[%s4041_s6 + $0xf0] ss:$36 sps:$4 sm:$0xff]  }
  0x24   :  { %819 = vmatprep.subr.bf16.mxu0 %v3135_v47  ;;  %v3186_v47 = vld [vmem:[%s4041_s6 + $0xac] ss:$36 sps:$4 sm:$0xff]  }
  0x27   :  { %820 = vmatpush1.bf16.msra.mxu0 %v3133_v49  ;;  %v3184_v49 = vld [vmem:[%s4041_s6 + $0xa8] ss:$36 sps:$4 sm:$0xff]  }
  0x28   :  { %821 = vmatprep.subr.bf16.mxu0 %v3141_v52  ;;  %v3187_v52 = vld [vmem:[%s4041_s6 + $0x58] ss:$36 sps:$4 sm:$0xff]  }
  0x2b   :  { %822 = vmatpush1.bf16.msra.mxu0 %v3139_v51  ;;  %v3192_v51 = vld [vmem:[%s4041_s6 + $0x64] ss:$36 sps:$4 sm:$0xff]  }
  0x2c   :  { %823 = vmatprep.subr.bf16.mxu0 %v3147_v55  ;;  %v3198_v55 = vld [vmem:[%s4041_s6 + $0x1c] ss:$36 sps:$4 sm:$0xff]  }
  0x2f   :  { %824 = vmatpush1.bf16.msra.mxu0 %v3145_v57  ;;  %v3196_v57 = vld [vmem:[%s4041_s6 + $0x18] ss:$36 sps:$4 sm:$0xff]  }
  0x30   :  { %915 = vmatprep.subr.bf16.mxu0 %v3153_v59  ;;  %v3202_v59 = vld [vmem:[%s4042_s5 + $0x4] ss:$36 sps:$4 sm:$0xff]  }
  0xd2   :  { %v2860_v7 = vpop.f32.mrf.mxu0 }
  0xd4   :  { %v137_v8 = vpop.f32.mrf.mxu0 }
  0xd6   :  { %v2861_v9 = vpop.f32.mrf.mxu0 }
  0xd7   :  { %2863 = vmatpush3.msra.mxu1 %v2861_v9 }
  0xd8   :  { %2864 = vmatprep.subr.mxu1 %v3246_v6  ;;  %v140_v10 = vpop.f32.mrf.mxu0 }
  0xd9   :  { %2865 = vmatpush3.msra.mxu1 %v2860_v7 }
  0xda   :  { %2866 = vmatprep.subr.mxu1 %v3246_v6 }
  0xdb   :  { %2867 = vmatpush3.msra.mxu1 %v140_v10 }
  0xdc   :  { %2868 = vmatprep.subr.mxu1 %v3246_v6 }
  0xdd   :  { %2869 = vmatpush3.msra.mxu1 %v137_v8 }
  0xde   :  { %2871 = vmatmul.mubr.msk.f32.vlgmr.msra.gmra.mxu1 %vm154_vm2, %v3248_v11  ;;  %2873 = vmatprep.subr.mxu1 %v3246_v6 }
  0xdf   :  { %2881 = vmatprep.mubr.msk.f32.mxu1 %vm3247_vm1, %v3246_v6 }
 0x19e   :  { %v224_v17 = vpop.f32.mrf.mxu1 }
 0x19f   :  { %v228_v18 = vmul.f32 0.03125, %v224_v17 }
 0x1a0   :  { %v2872_v19 = vpop.f32.mrf.mxu1 }
 0x1a1   :  { %v232_v20 = vrot.slane %v228_v18, %v3367_v16 }
 0x1a3   :  { %v3370_v21 = vsub.f32 %v2861_v9, %v232_v20  ;;  %v3372_v22 = vsub.f32 %v2860_v7, %v232_v20  ;;  %v3376_v24 = vsub.f32 %v140_v10, %v232_v20  ;;  %v3380_v26 = vsub.f32 %v137_v8, %v232_v20  ;;  %v2563_v7 = vld [vmem:[%s4045_s3] ss:$0 sm:$0xff]  ;;  %v3151_v20 = vld [vmem:[%s4041_s6 + $0x208] ss:$36 sps:$4 sm:$0xff]  }
 0x1a5   :  { %v240_v23 = vmul.f32 %v3370_v21, %v3370_v21  ;;  %v239_v25 = vmul.f32 %v3372_v22, %v3372_v22  ;;  %v238_v27 = vmul.f32 %v3376_v24, %v3376_v24  ;;  %v237_v29 = vmul.f32 %v3380_v26, %v3380_v26 }
 0x1a7   :  { %2874 = vmatpush3.msra.mxu1 %v240_v23  ;;  %v3154_v23 = vld [vmem:[%s4041_s6 + $0x210] ss:$36 sps:$4 sm:$0xff]  }
 0x1a8   :  { %2875 = vmatprep.subr.mxu1 %v3246_v6 }
 0x1a9   :  { %2876 = vmatpush3.msra.mxu1 %v239_v25  ;;  %v3159_v25 = vld [vmem:[%s4041_s6 + $0x1c4] ss:$36 sps:$4 sm:$0xff]  }
 0x1aa   :  { %2877 = vmatprep.subr.mxu1 %v3246_v6 }
 0x1ab   :  { %2878 = vmatpush3.msra.mxu1 %v238_v27 }
 0x1ac   :  { %2879 = vmatprep.subr.mxu1 %v3246_v6 }
 0x1ad   :  { %2880 = vmatpush3.msra.mxu1 %v237_v29  ;;  %v3157_v29 = vld [vmem:[%s4041_s6 + $0x1c0] ss:$36 sps:$4 sm:$0xff]  }
 0x1ae   :  { %2882 = vmatmul.mubr.msk.f32.vlgmr.msra.gmra.mxu1 %vm154_vm2, %v3248_v11  ;;  %862 = vmatprep.subr.bf16.mxu1 %v3108_v28 }
 0x1af   :  { %863 = vmatpush1.bf16.msra.mxu1 %v3106_v30  ;;  %894 = vmatprep.mubr.bf16.mxu1 %v3249_v60  ;;  %v3160_v30 = vld [vmem:[%s4041_s6 + $0x1c8] ss:$36 sps:$4 sm:$0xff]  }
 0x1b0   :  { %864 = vmatprep.subr.bf16.mxu1 %v3114_v32  ;;  %v3168_v32 = vld [vmem:[%s4041_s6 + $0x184] ss:$36 sps:$4 sm:$0xff]  }
 0x1b3   :  { %865 = vmatpush1.bf16.msra.mxu1 %v3112_v34 }
 0x1b4   :  { %866 = vmatprep.subr.bf16.mxu1 %v3120_v36  ;;  %v3166_v36 = vld [vmem:[%s4041_s6 + $0x180] ss:$36 sps:$4 sm:$0xff]  }
 0x1b7   :  { %867 = vmatpush1.bf16.msra.mxu1 %v3118_v38  ;;  %v3171_v38 = vld [vmem:[%s4041_s6 + $0x134] ss:$36 sps:$4 sm:$0xff]  }
 0x1b8   :  { %868 = vmatprep.subr.bf16.mxu1 %v3126_v40  ;;  %v3169_v40 = vld [vmem:[%s4041_s6 + $0x130] ss:$36 sps:$4 sm:$0xff]  }
 0x1bb   :  { %869 = vmatpush1.bf16.msra.mxu1 %v3124_v42  ;;  %v3177_v42 = vld [vmem:[%s4041_s6 + $0xec] ss:$36 sps:$4 sm:$0xff]  }
 0x1bc   :  { %870 = vmatprep.subr.bf16.mxu1 %v3132_v44  ;;  %v3175_v44 = vld [vmem:[%s4041_s6 + $0xe8] ss:$36 sps:$4 sm:$0xff]  }
 0x1bf   :  { %871 = vmatpush1.bf16.msra.mxu1 %v3130_v46  ;;  %v3183_v46 = vld [vmem:[%s4041_s6 + $0xa4] ss:$36 sps:$4 sm:$0xff]  }
 0x1c0   :  { %872 = vmatprep.subr.bf16.mxu1 %v3138_v48  ;;  %v3181_v48 = vld [vmem:[%s4041_s6 + $0xa0] ss:$36 sps:$4 sm:$0xff]  }
 0x1c3   :  { %873 = vmatpush1.bf16.msra.mxu1 %v3136_v50  ;;  %v3189_v50 = vld [vmem:[%s4041_s6 + $0x5c] ss:$36 sps:$4 sm:$0xff]  }
 0x1c4   :  { %874 = vmatprep.subr.bf16.mxu1 %v3144_v54  ;;  %v3195_v54 = vld [vmem:[%s4041_s6 + $0x14] ss:$36 sps:$4 sm:$0xff]  }
 0x1c7   :  { %875 = vmatpush1.bf16.msra.mxu1 %v3142_v53  ;;  %v3190_v53 = vld [vmem:[%s4041_s6 + $0x60] ss:$36 sps:$4 sm:$0xff]  }
 0x1c8   :  { %876 = vmatprep.subr.bf16.mxu1 %v3150_v56  ;;  %v3193_v56 = vld [vmem:[%s4041_s6 + $0x10] ss:$36 sps:$4 sm:$0xff]  }
 0x1cb   :  { %877 = vmatpush1.bf16.msra.mxu1 %v3148_v58  ;;  %v3199_v58 = vld [vmem:[%s4041_s6 + $0x218] ss:$36 sps:$4 sm:$0xff]  }
 0x1cc   :  { %968 = vmatprep.subr.bf16.mxu1 %v3156_v61  ;;  %v3200_v61 = vld [vmem:[%s4042_s5] ss:$36 sps:$4 sm:$0xff]  }
 0x26e   :  { %v307_v62 = vpop.f32.mrf.mxu1 }
 0x26f   :  { %v311_v63 = vmul.f32 0.03125, %v307_v62  ;;  %v3203_v62 = vld [vmem:[%s4041_s6 + $0x1d0] ss:$36 sps:$4 sm:$0xff]  }
 0x270   :  { %v2883_v0 = vpop.f32.mrf.mxu1 }
 0x271   :  { %v312_v1 = vadd.f32 1e-05, %v311_v63  ;;  %v3210_v63 = vld [vmem:[%s4042_s5 + $0xc] ss:$36 sps:$4 sm:$0xff]  }
 0x272   :  { %v3204_v0 = vld [vmem:[%s4041_s6 + $0x188] ss:$36 sps:$4 sm:$0xff]  }
 0x273   :  { %3240 = vrsqrt.f32 %v312_v1  ;;  %v3205_v1 = vld [vmem:[%s4041_s6 + $0x140] ss:$36 sps:$4 sm:$0xff]  }
 0x280   :  { %v3241_v3 = vpop.eup %3240 }
 0x281   :  { %v314_v4 = vmul.f32 %v3241_v3, %v152_v2  ;;  %v3206_v2 = vld [vmem:[%s4041_s6 + $0xf8] ss:$36 sps:$4 sm:$0xff]   ;;  %v3207_v3 = vld [vmem:[%s4043_s4] sm:$0xff]  }
 0x283   :  { %v318_v5 = vrot.slane %v314_v4, %v3367_v16  ;;  %v3208_v4 = vld [vmem:[%s4042_s5 + $0x8] ss:$36 sps:$4 sm:$0xff]  }
 0x285   :  { %v319_v8 = vmul.f32 %v318_v5, %v3380_v26  ;;  %v320_v9 = vmul.f32 %v318_v5, %v3376_v24  ;;  %v321_v10 = vmul.f32 %v318_v5, %v3372_v22  ;;  %v322_v12 = vmul.f32 %v318_v5, %v3370_v21  ;;  %v3162_v26 = vld [vmem:[%s4041_s6 + $0x1cc] ss:$36 sps:$4 sm:$0xff]  }
 0x286   :  { %v3211_v5 = vld [vmem:[%s4041_s6 + $0xb0] ss:$36 sps:$4 sm:$0xff]  }
 0x287   :  { %v329_v13 = vadd.f32 %v2563_v7, %v319_v8  ;;  %v330_v14 = vadd.f32 %v2563_v7, %v320_v9  ;;  %v331_v15 = vadd.f32 %v2563_v7, %v321_v10  ;;  %v332_v17 = vadd.f32 %v2563_v7, %v322_v12  ;;  %v3220_v7 = vld [vmem:[%s4042_s5 + $0x1c] ss:$36 sps:$4 sm:$0xff]   ;;  %v3212_v8 = vld [vmem:[%s4041_s6 + $0x68] ss:$36 sps:$4 sm:$0xff]   ;;  %v3217_v12 = vld [vmem:[%s4042_s5 + $0x14] ss:$36 sps:$4 sm:$0xff]  }
 0x288   :  { %v3213_v9 = vld [vmem:[%s4043_s4 + $0x8] sm:$0xff]   ;;  %v3214_v10 = vld [vmem:[%s4041_s6 + $0x20] ss:$36 sps:$4 sm:$0xff]  }
 0x289   :  { %vm333_vm3 = vcmp.ge.f32.partialorder %v329_v13, 0.0  ;;  %vm334_vm4 = vcmp.ge.f32.partialorder %v330_v14, 0.0  ;;  %v337_v18 = vmul.f32 0.2, %v329_v13  ;;  %v338_v19 = vmul.f32 0.2, %v330_v14 }
 0x28a   :  { %v339_v27 = vmul.f32 0.2, %v331_v15  ;;  %v340_v28 = vmul.f32 0.2, %v332_v17  ;;  %vm335_vm5 = vcmp.ge.f32.partialorder %v331_v15, 0.0  ;;  %vm336_vm6 = vcmp.ge.f32.partialorder %v332_v17, 0.0 }
 0x28b   :  { %v3506_v24 = vsel %vm333_vm3, %v329_v13, %v337_v18  ;;  %v3508_v22 = vsel %vm334_vm4, %v330_v14, %v338_v19  ;;  %v3215_v13 = vld [vmem:[%s4042_s5 + $0x10] ss:$36 sps:$4 sm:$0xff]   ;;  %v3218_v14 = vld [vmem:[%s4042_s5 + $0x18] ss:$36 sps:$4 sm:$0xff]  }
 0x28c   :  { %v3512_v21 = vpack.c.bf16 %v3508_v22, %v3506_v24  ;;  %v3536_v33 = vsel %vm335_vm5, %v331_v15, %v339_v27  ;;  %v3538_v34 = vsel %vm336_vm6, %v332_v17, %v340_v28  ;;  %v3221_v15 = vld [vmem:[%s4042_s5 + $0x20] ss:$36 sps:$4 sm:$0xff]   ;;  %v3222_v17 = vld [vmem:[%s4046_s7 + $0x10] sm:$0xff]  }
 0x28d   :  { %v3548_v37 = vpack.c.bf16 %v3538_v34, %v3536_v33  ;;  %v3224_v18 = vld [vmem:[%s4046_s7 + $0x30] sm:$0xff]  }
 0x28e   :  { %842 = vmatmul.mubr.bf16.vlgmr.msra.gmra.mxu0 %v3512_v21  ;;  %895 = vmatmul.mubr.bf16.vlgmr.msra.gmra.mxu1 %v3512_v21 }
 0x28f   :  { %916 = vmatpush1.bf16.msra.mxu0 %v3151_v20  ;;  %969 = vmatpush1.bf16.msra.mxu1 %v3154_v23 }
 0x290   :  { %917 = vmatprep.subr.bf16.mxu0 %v3159_v25  ;;  %970 = vmatprep.subr.bf16.mxu1 %v3162_v26 }
 0x291   :  { %851 = vmatprep.mubr.bf16.mxu0 %v3249_v60  ;;  %904 = vmatprep.mubr.bf16.mxu1 %v3249_v60 }
 0x293   :  { %918 = vmatpush1.bf16.msra.mxu0 %v3157_v29  ;;  %971 = vmatpush1.bf16.msra.mxu1 %v3160_v30 }
 0x294   :  { %919 = vmatprep.subr.bf16.mxu0 %v3165_v31  ;;  %972 = vmatprep.subr.bf16.mxu1 %v3168_v32 }
 0x296   :  { %852 = vmatmul.mubr.bf16.gmra.mxu0 %v3548_v37  ;;  %905 = vmatmul.mubr.bf16.gmra.mxu1 %v3548_v37 }
 0x297   :  { %920 = vmatpush1.bf16.msra.mxu0 %v3163_v35  ;;  %973 = vmatpush1.bf16.msra.mxu1 %v3166_v36 }
 0x298   :  { %921 = vmatprep.subr.bf16.mxu0 %v3171_v38  ;;  %974 = vmatprep.subr.bf16.mxu1 %v3174_v39 }
 0x299   :  { %947 = vmatprep.mubr.bf16.mxu0 %v3249_v60  ;;  %1000 = vmatprep.mubr.bf16.mxu1 %v3249_v60 }
 0x29b   :  { %922 = vmatpush1.bf16.msra.mxu0 %v3169_v40  ;;  %975 = vmatpush1.bf16.msra.mxu1 %v3172_v41 }
 0x29c   :  { %923 = vmatprep.subr.bf16.mxu0 %v3177_v42  ;;  %976 = vmatprep.subr.bf16.mxu1 %v3180_v43 }
 0x29f   :  { %924 = vmatpush1.bf16.msra.mxu0 %v3175_v44  ;;  %977 = vmatpush1.bf16.msra.mxu1 %v3178_v45 }
 0x2a0   :  { %925 = vmatprep.subr.bf16.mxu0 %v3183_v46  ;;  %978 = vmatprep.subr.bf16.mxu1 %v3186_v47 }
 0x2a3   :  { %926 = vmatpush1.bf16.msra.mxu0 %v3181_v48  ;;  %979 = vmatpush1.bf16.msra.mxu1 %v3184_v49 }
 0x2a4   :  { %927 = vmatprep.subr.bf16.mxu0 %v3189_v50  ;;  %980 = vmatprep.subr.bf16.mxu1 %v3192_v51 }
 0x2a7   :  { %928 = vmatpush1.bf16.msra.mxu0 %v3187_v52  ;;  %981 = vmatpush1.bf16.msra.mxu1 %v3190_v53 }
 0x2a8   :  { %929 = vmatprep.subr.bf16.mxu0 %v3195_v54  ;;  %982 = vmatprep.subr.bf16.mxu1 %v3198_v55 }
 0x2ab   :  { %930 = vmatpush1.bf16.msra.mxu0 %v3193_v56  ;;  %983 = vmatpush1.bf16.msra.mxu1 %v3196_v57 }
 0x2ac   :  { %2884 = vmatprep.subr.bf16.mxu0 %v3199_v58  ;;  %1147 = vmatprep.subr.bf16.mxu1 %v3202_v59 }
 0x2ae   :  { %948 = vmatmul.mubr.bf16.vlgmr.msra.gmra.mxu0 %v3512_v21  ;;  %1001 = vmatmul.mubr.bf16.vlgmr.msra.gmra.mxu1 %v3512_v21 }
 0x2af   :  { %2885 = vmatpush3.bf16.msra.mxu0 %v3199_v58  ;;  %1148 = vmatpush1.bf16.msra.mxu1 %v3200_v61 }
 0x2b0   :  { %2886 = vmatprep.subr.bf16.mxu0 %v3203_v62  ;;  %957 = vmatprep.mubr.bf16.mxu0 %v3249_v60 }
 0x2b1   :  { %1010 = vmatprep.mubr.bf16.mxu1 %v3249_v60  ;;  %1200 = vmatprep.subr.bf16.mxu1 %v3210_v63 }
 0x2b3   :  { %2887 = vmatpush3.bf16.msra.mxu0 %v3203_v62 }
 0x2b4   :  { %2888 = vmatprep.subr.bf16.mxu0 %v3204_v0 }
 0x2b6   :  { %958 = vmatmul.mubr.bf16.gmra.mxu0 %v3548_v37  ;;  %1011 = vmatmul.mubr.bf16.gmra.mxu1 %v3548_v37 }
 0x2b7   :  { %2889 = vmatpush3.bf16.msra.mxu0 %v3204_v0  ;;  %2900 = vmatprep.mubr.bf16.mxu0 %v3512_v21 }
 0x2b8   :  { %2890 = vmatprep.subr.bf16.mxu0 %v3205_v1  ;;  %1165 = vmatprep.mubr.bf16.mxu1 %v3249_v60 }
 0x2bb   :  { %2891 = vmatpush3.bf16.msra.mxu0 %v3205_v1 }
 0x2bc   :  { %2892 = vmatprep.subr.bf16.mxu0 %v3206_v2 }
 0x2be   :  { %2647 = vmatmul.mubr.msk.bf16.vlgmr.msra.gmra.mxu1 %vm1126_vm7, %v3207_v3 }
 0x2bf   :  { %2893 = vmatpush3.bf16.msra.mxu0 %v3206_v2  ;;  %1201 = vmatpush1.bf16.msra.mxu1 %v3208_v4 }
 0x2c0   :  { %2894 = vmatprep.subr.bf16.mxu0 %v3211_v5  ;;  %1175 = vmatprep.mubr.bf16.mxu1 %v3249_v60 }
 0x2c1   :  { %1306 = vmatprep.subr.bf16.mxu1 %v3220_v7 }
 0x2c3   :  { %2895 = vmatpush3.bf16.msra.mxu0 %v3211_v5 }
 0x2c4   :  { %2896 = vmatprep.subr.bf16.mxu0 %v3212_v8 }
 0x2c6   :  { %2648 = vmatmul.mubr.msk.bf16.gmra.mxu1 %vm1126_vm7, %v3213_v9 }
 0x2c7   :  { %2897 = vmatpush3.bf16.msra.mxu0 %v3212_v8  ;;  %1218 = vmatprep.mubr.bf16.mxu1 %v3249_v60 }
 0x2c8   :  { %2898 = vmatprep.subr.bf16.mxu0 %v3214_v10 }
 0x2cb   :  { %2899 = vmatpush3.bf16.msra.mxu0 %v3214_v10 }
 0x2cc   :  { %1253 = vmatprep.subr.bf16.mxu0 %v3217_v12 }
 0x2ce   :  { %2901 = vmatmul.mubr.bf16.vlgmr.msra.gmra.mxu0 %v3548_v37  ;;  %2649 = vmatmul.mubr.msk.bf16.vlgmr.msra.gmra.mxu1 %vm1126_vm7, %v3207_v3 }
 0x2cf   :  { %1254 = vmatpush1.bf16.msra.mxu0 %v3215_v13  ;;  %1307 = vmatpush1.bf16.msra.mxu1 %v3218_v14 }
 0x2d0   :  { %1228 = vmatprep.mubr.bf16.mxu1 %v3249_v60  ;;  %1271 = vmatprep.mubr.bf16.mxu0 %v3249_v60 }
 0x2d1   :  { %2904 = vmatprep.subr.bf16.mxu0 %v3221_v15 }
 0x2d6   :  { %2650 = vmatmul.mubr.msk.bf16.gmra.mxu1 %vm1126_vm7, %v3213_v9  ;;  %2651 = vmatmul.mubr.msk.bf16.vlgmr.msra.gmra.mxu0 %vm1126_vm7, %v3207_v3 }
 0x2d7   :  { %2905 = vmatpush3.bf16.msra.mxu0 %v3221_v15  ;;  %1281 = vmatprep.mubr.bf16.mxu0 %v3249_v60 }
 0x2d8   :  { %1324 = vmatprep.mubr.bf16.mxu1 %v3249_v60 }
 0x2de   :  { %2652 = vmatmul.mubr.msk.bf16.gmra.mxu0 %vm1126_vm7, %v3213_v9  ;;  %2653 = vmatmul.mubr.msk.bf16.vlgmr.msra.gmra.mxu1 %vm1126_vm7, %v3207_v3 }
 0x2df   :  { %1334 = vmatprep.mubr.bf16.mxu1 %v3249_v60  ;;  %2906 = vmatprep.mubr.msk.bf16.mxu0 %vm1126_vm7, %v3207_v3 }
 0x2e6   :  { %2654 = vmatmul.mubr.msk.bf16.gmra.mxu1 %vm1126_vm7, %v3213_v9  ;;  %2907 = vmatmul.mubr.msk.bf16.vlgmr.msra.gmra.mxu0 %vm1126_vm7, %v3213_v9 }
 0x2e7   :  { %2914 = vmatprep.mubr.msk.bf16.mxu0 %vm154_vm2, %v3222_v17  ;;  %2922 = vmatprep.mubr.msk.bf16.mxu1 %vm154_vm2, %v3224_v18 }
 0x34e   :  { %v896_v19 = vpop.f32.mrf.mxu1  ;;  %v843_v60 = vpop.f32.mrf.mxu0 }
 0x350   :  { %v3705_v20 = vpop.f32.mrf.mxu1  ;;  %v845_v23 = vpop.f32.mrf.mxu0 }
 0x352   :  { %v900_v21 = vpop.f32.mrf.mxu1  ;;  %v847_v25 = vpop.f32.mrf.mxu0 }
 0x354   :  { %v3707_v26 = vpop.f32.mrf.mxu1  ;;  %v849_v27 = vpop.f32.mrf.mxu0 }
 0x356   :  { %v3709_v28 = vpop.f32.mrf.mxu1  ;;  %v3711_v29 = vpop.f32.mrf.mxu0 }
 0x358   :  { %v3713_v30 = vpop.f32.mrf.mxu1  ;;  %v855_v31 = vpop.f32.mrf.mxu0 }
 0x35a   :  { %v3715_v32 = vpop.f32.mrf.mxu1  ;;  %v3717_v35 = vpop.f32.mrf.mxu0 }
 0x35c   :  { %v3719_v36 = vpop.f32.mrf.mxu1  ;;  %v859_v37 = vpop.f32.mrf.mxu0 }
 0x36e   :  { %v3721_v38 = vpop.f32.mrf.mxu1  ;;  %v3723_v39 = vpop.f32.mrf.mxu0 }
 0x370   :  { %v3725_v40 = vpop.f32.mrf.mxu1  ;;  %v3729_v42 = vpop.f32.mrf.mxu0 }
 0x372   :  { %v3727_v41 = vpop.f32.mrf.mxu1  ;;  %v3735_v45 = vpop.f32.mrf.mxu0 }
 0x374   :  { %v3731_v43 = vpop.f32.mrf.mxu1  ;;  %v3741_v48 = vpop.f32.mrf.mxu0 }
 0x376   :  { %v3733_v44 = vpop.f32.mrf.mxu1  ;;  %v3745_v51 = vpop.f32.mrf.mxu0 }
 0x378   :  { %v3737_v46 = vpop.f32.mrf.mxu1  ;;  %v3747_v56 = vpop.f32.mrf.mxu0 }
 0x37a   :  { %v3739_v47 = vpop.f32.mrf.mxu1  ;;  %v3753_v61 = vpop.f32.mrf.mxu0 }
 0x37c   :  { %v3743_v49 = vpop.f32.mrf.mxu1  ;;  %v965_v0 = vpop.f32.mrf.mxu0 }
 0x37e   :  { %v1167_v50 = vpop.f32.mrf.mxu1 }
 0x37f   :  { %v1168_v54 = vadd.f32 %v1167_v50, %v843_v60  ;;  %v3226_v50 = vld [vmem:[%s4046_s7 + $0x50] sm:$0xff]  }
 0x380   :  { %v1169_v52 = vpop.f32.mrf.mxu1 }
 0x381   :  { %v1170_v8 = vadd.f32 %v1169_v52, %v845_v23  ;;  %v3223_v23 = vld [vmem:[%s4046_s7 + $0x18] sm:$0xff]  }
 0x382   :  { %v1171_v53 = vpop.f32.mrf.mxu1 }
 0x383   :  { %v1172_v55 = vadd.f32 %v1171_v53, %v847_v25 }
 0x384   :  { %v1173_v57 = vpop.f32.mrf.mxu1 }
 0x385   :  { %v3749_v58 = vpack.c.bf16 %v1172_v55, %v1168_v54  ;;  %v1174_v2 = vadd.f32 %v1173_v57, %v849_v27 }
 0x386   :  { %v3751_v59 = vpop.f32.mrf.mxu1 }
 0x387   :  { %v1395_v13 = vpack.c.bf16 %v1174_v2, %v1170_v8 }
 0x388   :  { %v1179_v62 = vpop.f32.mrf.mxu1 }
 0x389   :  { %v1180_v3 = vadd.f32 %v1179_v62, %v855_v31 }
 0x38a   :  { %v3755_v63 = vpop.f32.mrf.mxu1 }
 0x38c   :  { %v1183_v1 = vpop.f32.mrf.mxu1 }
 0x38d   :  { %v1184_v4 = vadd.f32 %v1183_v1, %v859_v37 }
 0x38e   :  { %v3757_v5 = vpop.f32.mrf.mxu0  ;;  %v1220_v7 = vpop.f32.mrf.mxu1 }
 0x38f   :  { %v1404_v9 = vpack.c.bf16 %v1184_v4, %v1180_v3  ;;  %v1221_v17 = vadd.f32 %v1220_v7, %v896_v19 }
 0x390   :  { %v3759_v10 = vpop.f32.mrf.mxu0  ;;  %v1222_v12 = vpop.f32.mrf.mxu1 }
 0x391   :  { %2910 = vmatprep.subr.bf16.mxu0 %v1404_v9 }
 0x392   :  { %v3761_v14 = vpop.f32.mrf.mxu0  ;;  %v1224_v15 = vpop.f32.mrf.mxu1  ;;  %2911 = vmatpush3.bf16.msra.mxu0 %v1404_v9  ;;  %v1223_v9 = vadd.f32 %v1222_v12, %v3705_v20 }
 0x393   :  { %v1225_v18 = vadd.f32 %v1224_v15, %v900_v21  ;;  %2912 = vmatprep.subr.bf16.mxu0 %v1395_v13 }
 0x394   :  { %v3763_v60 = vpop.f32.mrf.mxu0  ;;  %v1226_v25 = vpop.f32.mrf.mxu1 }
 0x395   :  { %v3765_v27 = vpack.c.bf16 %v1225_v18, %v1221_v17  ;;  %v1227_v1 = vadd.f32 %v1226_v25, %v3707_v26 }
 0x396   :  { %v1230_v31 = vpop.f32.mrf.mxu1  ;;  %v3770_v37 = vpop.f32.mrf.mxu0  ;;  %2913 = vmatpush3.bf16.msra.mxu0 %v1395_v13 }
 0x397   :  { %v1231_v54 = vadd.f32 %v1230_v31, %v3709_v28  ;;  %v1397_v17 = vpack.c.bf16 %v1227_v1, %v1223_v9 }
 0x398   :  { %v1232_v19 = vpop.f32.mrf.mxu1  ;;  %v1275_v21 = vpop.f32.mrf.mxu0 }
 0x399   :  { %2915 = vmatmul.mubr.msk.bf16.vlgmr.msra.gmra.mxu0 %vm154_vm2, %v3223_v23  ;;  %v1233_v2 = vadd.f32 %v1232_v19, %v3713_v30 }
 0x39a   :  { %v1234_v52 = vpop.f32.mrf.mxu1  ;;  %v3776_v53 = vpop.f32.mrf.mxu0  ;;  %2930 = vmatprep.mubr.msk.bf16.mxu0 %vm154_vm2, %v3226_v50  ;;  %v3225_v50 = vld [vmem:[%s4046_s7 + $0x38] sm:$0xff]  }
 0x39b   :  { %v1235_v55 = vadd.f32 %v1234_v52, %v3715_v32 }
 0x39c   :  { %v1236_v57 = vpop.f32.mrf.mxu1  ;;  %v1279_v62 = vpop.f32.mrf.mxu0 }
 0x39d   :  { %v3783_v3 = vpack.c.bf16 %v1235_v55, %v1231_v54  ;;  %v1237_v4 = vadd.f32 %v1236_v57, %v3719_v36  ;;  %v1280_v23 = vadd.f32 %v1279_v62, %v3741_v48 }
 0x39e   :  { %v3786_v7 = vpop.f32.mrf.mxu0  ;;  %v1326_v8 = vpop.f32.mrf.mxu1 }
 0x39f   :  { %v1406_v13 = vpack.c.bf16 %v1237_v4, %v1233_v2  ;;  %v1327_v26 = vadd.f32 %v1326_v8, %v3721_v38  ;;  %v3228_v38 = vld [vmem:[%s4046_s7 + $0x70] sm:$0xff]  }
 0x3a0   :  { %v1285_v15 = vpop.f32.mrf.mxu0  ;;  %v1328_v28 = vpop.f32.mrf.mxu1 }
 0x3a1   :  { %2918 = vmatprep.subr.bf16.mxu1 %v1406_v13  ;;  %v1286_v20 = vadd.f32 %v1285_v15, %v3747_v56 }
 0x3a2   :  { %v3789_v32 = vpop.f32.mrf.mxu0  ;;  %v1330_v18 = vpop.f32.mrf.mxu1  ;;  %2919 = vmatpush3.bf16.msra.mxu1 %v1406_v13 }
 0x3a3   :  { %v1331_v30 = vadd.f32 %v1330_v18, %v3727_v41  ;;  %2920 = vmatprep.subr.bf16.mxu1 %v1397_v17  ;;  %v1276_v41 = vadd.f32 %v1275_v21, %v3729_v42 }
 0x3a4   :  { %v1289_v36 = vpop.f32.mrf.mxu0  ;;  %v1332_v25 = vpop.f32.mrf.mxu1 }
 0x3a5   :  { %v3795_v12 = vpack.c.bf16 %v1331_v30, %v1327_v26  ;;  %v1290_v31 = vadd.f32 %v1289_v36, %v965_v0  ;;  %v1399_v56 = vpack.c.bf16 %v1280_v23, %v1276_v41  ;;  %v1333_v21 = vadd.f32 %v1332_v25, %v3731_v43  ;;  %v3234_v30 = vld [vmem:[%s4046_s7 + $0x8] sm:$0xff]  }
 0x3a6   :  { %v1336_v19 = vpop.f32.mrf.mxu1  ;;  %v2908_v52 = vpop.f32.mrf.mxu0  ;;  %2921 = vmatpush3.bf16.msra.mxu1 %v1397_v17  ;;  %v1284_v26 = vadd.f32 %v3786_v7, %v3745_v51  ;;  %v3235_v51 = vld [vmem:[%s4046_s7 + $0x28] sm:$0xff]  }
 0x3a7   :  { %v1408_v54 = vpack.c.bf16 %v1290_v31, %v1286_v20  ;;  %v1337_v62 = vadd.f32 %v1336_v19, %v3733_v44  ;;  %v1388_v1 = vadd.f32 %v2908_v52, %v3757_v5  ;;  %v3227_v44 = vld [vmem:[%s4046_s7 + $0x58] sm:$0xff]  }
 0x3a8   :  { %v1338_v48 = vpop.f32.mrf.mxu1  ;;  %v1379_v55 = vpop.f32.mrf.mxu0 }
 0x3a9   :  { %2926 = vmatprep.subr.bf16.mxu0 %v1408_v54  ;;  %2923 = vmatmul.mubr.msk.bf16.vlgmr.msra.gmra.mxu1 %vm154_vm2, %v3225_v50  ;;  %v1339_v4 = vadd.f32 %v1338_v48, %v3737_v46  ;;  %v1380_v5 = vadd.f32 %v1379_v55, %v3759_v10  ;;  %v3229_v46 = vld [vmem:[%s4046_s7 + $0x80] sm:$0xff]  }
 0x3aa   :  { %v1340_v0 = vpop.f32.mrf.mxu1  ;;  %v2909_v57 = vpop.f32.mrf.mxu0  ;;  %2927 = vmatpush3.bf16.msra.mxu0 %v1408_v54  ;;  %2938 = vmatprep.mubr.msk.bf16.mxu1 %vm154_vm2, %v3228_v38 }
 0x3ab   :  { %v1341_v2 = vadd.f32 %v1340_v0, %v3739_v47  ;;  %v1391_v42 = vadd.f32 %v2909_v57, %v3761_v14  ;;  %2928 = vmatprep.subr.bf16.mxu0 %v1399_v56  ;;  %v1329_v47 = vadd.f32 %v1328_v28, %v3725_v40  ;;  %v1178_v40 = vadd.f32 %v3751_v59, %v3711_v29  ;;  %v3230_v28 = vld [vmem:[%s4046_s7 + $0x78] sm:$0xff]   ;;  %v3232_v29 = vld [vmem:[%s4046_s7] sm:$0xff]  }
 0x3ac   :  { %v1342_v8 = vpop.f32.mrf.mxu1  ;;  %v1382_v9 = vpop.f32.mrf.mxu0  ;;  %v3233_v59 = vld [vmem:[%s4046_s7 + $0x20] sm:$0xff]  }
 0x3ad   :  { %v1409_v13 = vpack.c.bf16 %v1341_v2, %v1337_v62  ;;  %v1411_v15 = vpack.c.bf16 %v1391_v42, %v1388_v1  ;;  %v1343_v17 = vadd.f32 %v1342_v8, %v3743_v49  ;;  %v1383_v18 = vadd.f32 %v1382_v9, %v3763_v60 }
 0x3ae   :  { %2929 = vmatpush3.bf16.msra.mxu0 %v1399_v56  ;;  %v1182_v49 = vadd.f32 %v3755_v63, %v3717_v35  ;;  %v1401_v14 = vpack.c.bf16 %v1333_v21, %v1329_v47  ;;  %v3231_v35 = vld [vmem:[%s4046_s7 + $0x88] sm:$0xff]   ;;  %v1288_v63 = vadd.f32 %v3789_v32, %v3753_v61  ;;  %v1278_v61 = vadd.f32 %v3776_v53, %v3735_v45  ;;  %v3236_v45 = vld [vmem:[%s4046_s7 + $0x40] sm:$0xff]  }
 0x3af   :  { %v1410_v43 = vpack.c.bf16 %v1343_v17, %v1339_v4  ;;  %2942 = vmatprep.subr.bf16.mxu0 %v1411_v15  ;;  %v1402_v60 = vpack.c.bf16 %v1383_v18, %v1380_v5  ;;  %v3237_v53 = vld [vmem:[%s4046_s7 + $0x60] sm:$0xff]  }
 0x3b0   :  { %v1403_v10 = vpack.c.bf16 %v1182_v49, %v1178_v40  ;;  %v1407_v32 = vpack.c.bf16 %v1288_v63, %v1284_v26 }
 0x3b1   :  { %2931 = vmatmul.mubr.msk.bf16.vlgmr.msra.gmra.mxu0 %vm154_vm2, %v3227_v44  ;;  %2934 = vmatprep.subr.bf16.mxu1 %v1410_v43 }
 0x3b2   :  { %2935 = vmatpush3.bf16.msra.mxu1 %v1410_v43  ;;  %2943 = vmatpush3.bf16.msra.mxu0 %v1411_v15 }
 0x3b3   :  { %2936 = vmatprep.subr.bf16.mxu1 %v1401_v14  ;;  %2944 = vmatprep.subr.bf16.mxu0 %v1402_v60 }
 0x3b4   :  { %2946 = vmatprep.mubr.msk.bf16.mxu0 %vm154_vm2, %v3229_v46 }
 0x3b6   :  { %2937 = vmatpush3.bf16.msra.mxu1 %v1401_v14  ;;  %2945 = vmatpush3.bf16.msra.mxu0 %v1402_v60 }
 0x3b7   :  { %2950 = vmatprep.subr.bf16.mxu1 %v1403_v10  ;;  %2958 = vmatprep.subr.bf16.mxu0 %v3783_v3 }
 0x3b9   :  { %2939 = vmatmul.mubr.msk.bf16.vlgmr.msra.gmra.mxu1 %vm154_vm2, %v3230_v28  ;;  %2947 = vmatmul.mubr.msk.bf16.vlgmr.msra.gmra.mxu0 %vm154_vm2, %v3231_v35 }
 0x3ba   :  { %2951 = vmatpush3.bf16.msra.mxu1 %v1403_v10  ;;  %2959 = vmatpush3.bf16.msra.mxu0 %v3783_v3  ;;  %v1274_v3 = vadd.f32 %v3770_v37, %v3723_v39  ;;  %v3238_v39 = vld [vmem:[%s4046_s7 + $0x48] sm:$0xff]  }
 0x3bb   :  { %2952 = vmatprep.subr.bf16.mxu1 %v3749_v58  ;;  %2960 = vmatprep.subr.bf16.mxu0 %v3765_v27 }
 0x3bc   :  { %2954 = vmatprep.mubr.msk.bf16.mxu1 %vm154_vm2, %v3232_v29  ;;  %2962 = vmatprep.mubr.msk.bf16.mxu0 %vm154_vm2, %v3233_v59  ;;  %v1398_v7 = vpack.c.bf16 %v1278_v61, %v1274_v3 }
 0x3be   :  { %2953 = vmatpush3.bf16.msra.mxu1 %v3749_v58  ;;  %2961 = vmatpush3.bf16.msra.mxu0 %v3765_v27  ;;  %v3239_v58 = vld [vmem:[%s4046_s7 + $0x68] sm:$0xff]  }
 0x3bf   :  { %2966 = vmatprep.subr.bf16.mxu1 %v1407_v32  ;;  %2974 = vmatprep.subr.bf16.mxu0 %v1409_v13 }
 0x3c1   :  { %2955 = vmatmul.mubr.msk.bf16.vlgmr.msra.gmra.mxu1 %vm154_vm2, %v3234_v30  ;;  %2963 = vmatmul.mubr.msk.bf16.vlgmr.msra.gmra.mxu0 %vm154_vm2, %v3235_v51 }
 0x3c2   :  { %2967 = vmatpush3.bf16.msra.mxu1 %v1407_v32  ;;  %2975 = vmatpush3.bf16.msra.mxu0 %v1409_v13 }
 0x3c3   :  { %2968 = vmatprep.subr.bf16.mxu1 %v1398_v7  ;;  %2976 = vmatprep.subr.bf16.mxu0 %v3795_v12 }
 0x3c4   :  { %2970 = vmatprep.mubr.msk.bf16.mxu1 %vm154_vm2, %v3236_v45  ;;  %2978 = vmatprep.mubr.msk.bf16.mxu0 %vm154_vm2, %v3237_v53 }
 0x3c6   :  { %2969 = vmatpush3.bf16.msra.mxu1 %v1398_v7  ;;  %2977 = vmatpush3.bf16.msra.mxu0 %v3795_v12 }
 0x3c7   :  { %2982 = vmatprep.subr.mxu1 %v3246_v6  ;;  %2993 = vmatprep.subr.mxu0 %v3246_v6 }
 0x3c9   :  { %2971 = vmatmul.mubr.msk.bf16.vlgmr.msra.gmra.mxu1 %vm154_vm2, %v3238_v39  ;;  %2979 = vmatmul.mubr.msk.bf16.vlgmr.msra.gmra.mxu0 %vm154_vm2, %v3239_v58 }
 0x3ca   :  { %2990 = vmatprep.mubr.msk.f32.mxu1 %vm3247_vm1, %v3246_v6  ;;  %3001 = vmatprep.mubr.msk.f32.mxu0 %vm3247_vm1, %v3246_v6 }
 0x459   :  { %v2916_v27 = vpop.f32.mrf.mxu0 }
 0x45b   :  { %v1471_v37 = vpop.f32.mrf.mxu0 }
 0x45d   :  { %v2917_v36 = vpop.f32.mrf.mxu0 }
 0x45f   :  { %v1474_v23 = vpop.f32.mrf.mxu0 }
 0x469   :  { %v2924_v25 = vpop.f32.mrf.mxu1 }
 0x46b   :  { %v1546_v20 = vpop.f32.mrf.mxu1 }
 0x46d   :  { %v2925_v31 = vpop.f32.mrf.mxu1 }
 0x46f   :  { %v1549_v52 = vpop.f32.mrf.mxu1 }
 0x471   :  { %v2932_v12 = vpop.f32.mrf.mxu0 }
 0x473   :  { %v1621_v50 = vpop.f32.mrf.mxu0 }
 0x475   :  { %v2933_v19 = vpop.f32.mrf.mxu0 }
 0x477   :  { %v1624_v38 = vpop.f32.mrf.mxu0 }
 0x479   :  { %v2940_v41 = vpop.f32.mrf.mxu1  ;;  %v2948_v54 = vpop.f32.mrf.mxu0 }
 0x47b   :  { %v1696_v48 = vpop.f32.mrf.mxu1  ;;  %v1766_v55 = vpop.f32.mrf.mxu0 }
 0x47d   :  { %v2941_v56 = vpop.f32.mrf.mxu1  ;;  %v2949_v0 = vpop.f32.mrf.mxu0 }
 0x47f   :  { %v1699_v57 = vpop.f32.mrf.mxu1  ;;  %v1769_v62 = vpop.f32.mrf.mxu0 }
 0x481   :  { %v2956_v1 = vpop.f32.mrf.mxu1  ;;  %v2964_v2 = vpop.f32.mrf.mxu0 }
 0x482   :  { %v1840_v47 = vadd.f32 %v2956_v1, %v2916_v27  ;;  %v1905_v5 = vadd.f32 %v2964_v2, %v2924_v25 }
 0x483   :  { %v1831_v42 = vpop.f32.mrf.mxu1  ;;  %v1896_v21 = vpop.f32.mrf.mxu0 }
 0x484   :  { %v2043_v63 = vadd.f32 %v1905_v5, %v1840_v47  ;;  %v1832_v26 = vadd.f32 %v1831_v42, %v1471_v37  ;;  %v1897_v3 = vadd.f32 %v1896_v21, %v1546_v20  ;;  %v2339_v42 = vld [vmem:[%s4047_s11] sm:$0xff] }
 0x485   :  { %v2957_v4 = vpop.f32.mrf.mxu1  ;;  %v2965_v8 = vpop.f32.mrf.mxu0 }
 0x486   :  { %v1843_v49 = vadd.f32 %v2957_v4, %v2917_v36  ;;  %v1908_v14 = vadd.f32 %v2965_v8, %v2925_v31  ;;  %v2041_v31 = vadd.f32 %v1897_v3, %v1832_v26  ;;  %v2343_v4 = vmul.f32 %v2339_v42, %v3506_v24  ;;  %v2340_v24 = vld [vmem:[%s4047_s11 + $0x8] sm:$0xff]  ;;  %v2341_v8 = vld [vmem:[%s4047_s11 + $0x10] sm:$0xff] }
 0x487   :  { %v1834_v9 = vpop.f32.mrf.mxu1  ;;  %v1899_v13 = vpop.f32.mrf.mxu0 }
 0x488   :  { %v1835_v61 = vadd.f32 %v1834_v9, %v1474_v23  ;;  %v1900_v32 = vadd.f32 %v1899_v13, %v1549_v52  ;;  %v2044_v45 = vadd.f32 %v1908_v14, %v1843_v49  ;;  %v2344_v9 = vmul.f32 %v2340_v24, %v3508_v22 }
 0x489   :  { %v2972_v15 = vpop.f32.mrf.mxu1  ;;  %v2980_v17 = vpop.f32.mrf.mxu0  ;;  %v2345_v13 = vmul.f32 %v2341_v8, %v3536_v33 }
 0x48a   :  { %v1970_v18 = vadd.f32 %v2972_v15, %v2932_v12  ;;  %v2035_v44 = vadd.f32 %v2980_v17, %v2940_v41  ;;  %v2042_v25 = vadd.f32 %v1900_v32, %v1835_v61  ;;  %v2342_v15 = vld [vmem:[%s4047_s11 + $0x18] sm:$0xff] }
 0x48b   :  { %v1961_v43 = vpop.f32.mrf.mxu1  ;;  %v2026_v46 = vpop.f32.mrf.mxu0  ;;  %v2346_v17 = vmul.f32 %v2342_v15, %v3538_v34 }
 0x48c   :  { %v2047_v60 = vadd.f32 %v2035_v44, %v1970_v18  ;;  %v1962_v28 = vadd.f32 %v1961_v43, %v1621_v50  ;;  %v2027_v35 = vadd.f32 %v2026_v46, %v1696_v48  ;;  %v2727_v46 = vld [vmem:[%s4049_s9] ss:$0 sm:$0xff] }
 0x48d   :  { %v2973_v40 = vpop.f32.mrf.mxu1  ;;  %v2981_v10 = vpop.f32.mrf.mxu0 }
 0x48e   :  { %v1973_v29 = vadd.f32 %v2973_v40, %v2933_v19  ;;  %v2038_v59 = vadd.f32 %v2981_v10, %v2941_v56  ;;  %v2051_v58 = vadd.f32 %v2047_v60, %v2043_v63  ;;  %v2045_v27 = vadd.f32 %v2027_v35, %v1962_v28 }
 0x48f   :  { %v1964_v30 = vpop.f32.mrf.mxu1  ;;  %v2029_v51 = vpop.f32.mrf.mxu0 }
 0x490   :  { %v2048_v53 = vadd.f32 %v2038_v59, %v1973_v29  ;;  %v1965_v7 = vadd.f32 %v1964_v30, %v1624_v38  ;;  %v2030_v39 = vadd.f32 %v2029_v51, %v1699_v57  ;;  %v2055_v41 = vadd.f32 %v2948_v54, %v2051_v58  ;;  %v2247_v29 = vld [vmem:[%s4050_s10 + $0x8] sm:$0xff]  ;;  %v2248_v51 = vld [vmem:[%s4050_s10 + $0x10] sm:$0xff] }
 0x491   :  { %v2049_v48 = vadd.f32 %v2045_v27, %v2041_v31  ;;  %v2249_v27 = vld [vmem:[%s4050_s10 + $0x18] sm:$0xff] }
 0x492   :  { %v2052_v36 = vadd.f32 %v2048_v53, %v2044_v45  ;;  %v2046_v12 = vadd.f32 %v2030_v39, %v1965_v7 }
 0x493   :  { %v2053_v23 = vadd.f32 %v2049_v48, %v1766_v55 }
 0x494   :  { %v2056_v50 = vadd.f32 %v2949_v0, %v2052_v36  ;;  %v2050_v19 = vadd.f32 %v2046_v12, %v2042_v25 }
 0x496   :  { %2983 = vmatpush3.msra.mxu1 %v2056_v50  ;;  %v2054_v37 = vadd.f32 %v2050_v19, %v1769_v62 }
 0x497   :  { %2984 = vmatprep.subr.mxu1 %v3246_v6 }
 0x498   :  { %2985 = vmatpush3.msra.mxu1 %v2055_v41 }
 0x499   :  { %2986 = vmatprep.subr.mxu1 %v3246_v6 }
 0x49a   :  { %2987 = vmatpush3.msra.mxu1 %v2054_v37 }
 0x49b   :  { %2988 = vmatprep.subr.mxu1 %v3246_v6 }
 0x49c   :  { %2989 = vmatpush3.msra.mxu1 %v2053_v23 }
 0x49d   :  { %2991 = vmatmul.mubr.msk.f32.vlgmr.msra.gmra.mxu1 %vm154_vm2, %v3248_v11  ;;  %3004 = vmatprep.subr.mxu1 %v3248_v11 }
 0x49e   :  { %3005 = vmatpush3.msra.mxu1 %v3248_v11 }
 0x49f   :  { %3006 = vmatprep.subr.mxu1 %v3248_v11 }
 0x4a0   :  { %3007 = vmatpush3.msra.mxu1 %v3248_v11 }
 0x4a1   :  { %3008 = vmatprep.subr.mxu1 %v3248_v11 }
 0x4a2   :  { %3009 = vmatpush3.msra.mxu1 %v3248_v11 }
 0x4a3   :  { %3010 = vmatprep.subr.mxu1 %v3248_v11 }
 0x4a4   :  { %3011 = vmatpush3.msra.mxu1 %v3248_v11 }
 0x4a5   :  { %3012 = vmatprep.subr.mxu1 %v3248_v11 }
 0x4a6   :  { %3013 = vmatpush3.msra.mxu1 %v3248_v11 }
 0x4a7   :  { %3014 = vmatprep.subr.mxu1 %v3248_v11 }
 0x4a8   :  { %3015 = vmatpush3.msra.mxu1 %v3248_v11 }
 0x4a9   :  { %3016 = vmatprep.subr.mxu1 %v3248_v11 }
 0x4aa   :  { %3017 = vmatpush3.msra.mxu1 %v3248_v11 }
 0x4ab   :  { %3018 = vmatprep.subr.mxu1 %v3248_v11 }
 0x4ac   :  { %3019 = vmatpush3.msra.mxu1 %v3248_v11 }
 0x4ad   :  { %3020 = vmatprep.subr.mxu1 %v3248_v11 }
 0x4ae   :  { %3021 = vmatpush3.msra.mxu1 %v3248_v11 }
 0x4af   :  { %3022 = vmatprep.subr.mxu1 %v3248_v11 }
 0x4b0   :  { %3023 = vmatpush3.msra.mxu1 %v3248_v11 }
 0x4b1   :  { %3024 = vmatprep.subr.mxu1 %v3248_v11 }
 0x4b2   :  { %3025 = vmatpush3.msra.mxu1 %v3248_v11 }
 0x4b3   :  { %3026 = vmatprep.subr.mxu1 %v3248_v11 }
 0x4b4   :  { %3027 = vmatpush3.msra.mxu1 %v3248_v11 }
 0x4b5   :  { %3028 = vmatprep.subr.mxu1 %v3248_v11 }
 0x4b6   :  { %3029 = vmatpush3.msra.mxu1 %v3248_v11 }
 0x4b7   :  { %3030 = vmatprep.subr.mxu1 %v3248_v11 }
 0x4b8   :  { %3031 = vmatpush3.msra.mxu1 %v3248_v11 }
 0x4b9   :  { %3032 = vmatprep.subr.mxu1 %v3248_v11 }
 0x4ba   :  { %3033 = vmatpush3.msra.mxu1 %v3248_v11 }
 0x4bb   :  { %3034 = vmatprep.subr.mxu1 %v3248_v11 }
 0x4bc   :  { %3035 = vmatpush3.msra.mxu1 %v3248_v11 }
 0x4bd   :  { %3080 = vmatprep.subr.mxu1 %v3246_v6 }
 0x55d   :  { %v2125_v20 = vpop.f32.mrf.mxu1 }
 0x55e   :  { %v2129_v52 = vmul.f32 0.03125, %v2125_v20 }
 0x55f   :  { %v2992_v38 = vpop.f32.mrf.mxu1 }
 0x560   :  { %v2133_v54 = vrot.slane %v2129_v52, %v3367_v16 }
 0x562   :  { %v3929_v55 = vsub.f32 %v2056_v50, %v2133_v54  ;;  %v3931_v56 = vsub.f32 %v2055_v41, %v2133_v54  ;;  %v3935_v57 = vsub.f32 %v2054_v37, %v2133_v54  ;;  %v3939_v1 = vsub.f32 %v2053_v23, %v2133_v54 }
 0x564   :  { %v2141_v0 = vmul.f32 %v3929_v55, %v3929_v55  ;;  %v2140_v62 = vmul.f32 %v3931_v56, %v3931_v56  ;;  %v2139_v2 = vmul.f32 %v3935_v57, %v3935_v57  ;;  %v2138_v21 = vmul.f32 %v3939_v1, %v3939_v1 }
 0x566   :  { %2994 = vmatpush3.msra.mxu0 %v2141_v0 }
 0x567   :  { %2995 = vmatprep.subr.mxu0 %v3246_v6 }
 0x568   :  { %2996 = vmatpush3.msra.mxu0 %v2140_v62 }
 0x569   :  { %2997 = vmatprep.subr.mxu0 %v3246_v6 }
 0x56a   :  { %2998 = vmatpush3.msra.mxu0 %v2139_v2 }
 0x56b   :  { %2999 = vmatprep.subr.mxu0 %v3246_v6 }
 0x56c   :  { %3000 = vmatpush3.msra.mxu0 %v2138_v21 }
 0x56d   :  { %3002 = vmatmul.mubr.msk.f32.vlgmr.msra.gmra.mxu0 %vm154_vm2, %v3248_v11  ;;  %3042 = vmatprep.subr.mxu0 %v3248_v11 }
 0x56e   :  { %3043 = vmatpush3.msra.mxu0 %v3248_v11  ;;  %3074 = vmatprep.mubr.f32.mxu0 %v2343_v4 }
 0x56f   :  { %3044 = vmatprep.subr.mxu0 %v3248_v11 }
 0x570   :  { %3045 = vmatpush3.msra.mxu0 %v3248_v11 }
 0x571   :  { %3046 = vmatprep.subr.mxu0 %v3248_v11 }
 0x572   :  { %3047 = vmatpush3.msra.mxu0 %v3248_v11 }
 0x573   :  { %3048 = vmatprep.subr.mxu0 %v3248_v11 }
 0x574   :  { %3049 = vmatpush3.msra.mxu0 %v3248_v11 }
 0x575   :  { %3050 = vmatprep.subr.mxu0 %v3248_v11 }
 0x576   :  { %3051 = vmatpush3.msra.mxu0 %v3248_v11 }
 0x577   :  { %3052 = vmatprep.subr.mxu0 %v3248_v11 }
 0x578   :  { %3053 = vmatpush3.msra.mxu0 %v3248_v11 }
 0x579   :  { %3054 = vmatprep.subr.mxu0 %v3248_v11 }
 0x57a   :  { %3055 = vmatpush3.msra.mxu0 %v3248_v11 }
 0x57b   :  { %3056 = vmatprep.subr.mxu0 %v3248_v11 }
 0x57c   :  { %3057 = vmatpush3.msra.mxu0 %v3248_v11 }
 0x57d   :  { %3058 = vmatprep.subr.mxu0 %v3248_v11 }
 0x57e   :  { %3059 = vmatpush3.msra.mxu0 %v3248_v11 }
 0x57f   :  { %3060 = vmatprep.subr.mxu0 %v3248_v11 }
 0x580   :  { %3061 = vmatpush3.msra.mxu0 %v3248_v11 }
 0x581   :  { %3062 = vmatprep.subr.mxu0 %v3248_v11 }
 0x582   :  { %3063 = vmatpush3.msra.mxu0 %v3248_v11 }
 0x583   :  { %3064 = vmatprep.subr.mxu0 %v3248_v11 }
 0x584   :  { %3065 = vmatpush3.msra.mxu0 %v3248_v11 }
 0x585   :  { %3066 = vmatprep.subr.mxu0 %v3248_v11 }
 0x586   :  { %3067 = vmatpush3.msra.mxu0 %v3248_v11 }
 0x587   :  { %3068 = vmatprep.subr.mxu0 %v3248_v11 }
 0x588   :  { %3069 = vmatpush3.msra.mxu0 %v3248_v11 }
 0x589   :  { %3070 = vmatprep.subr.mxu0 %v3248_v11 }
 0x58a   :  { %3071 = vmatpush3.msra.mxu0 %v3248_v11 }
 0x58b   :  { %3072 = vmatprep.subr.mxu0 %v3248_v11 }
 0x58c   :  { %3073 = vmatpush3.msra.mxu0 %v3248_v11  ;;  %v2057_v11 = vld [vmem:[%s4048_s8] sm:$0x1] }
 0x58d   :  { %3075 = vmatmul.mubr.f32.vlgmr.msra.gmra.mxu0 %v2344_v9 }
 0x58e   :  { %3077 = vmatprep.mubr.f32.mxu0 %v2345_v13 }
 0x591   :  { %3078 = vmatmul.mubr.f32.gmra.mxu0 %v2346_v17 }
 0x62d   :  { %v2208_v18 = vpop.f32.mrf.mxu0 }
 0x62e   :  { %v2212_v44 = vmul.f32 0.03125, %v2208_v18 }
 0x62f   :  { %v3003_v47 = vpop.f32.mrf.mxu0 }
 0x630   :  { %v2213_v5 = vadd.f32 1e-05, %v2212_v44 }
 0x632   :  { %3242 = vrsqrt.f32 %v2213_v5 }
 0x63f   :  { %v3243_v22 = vpop.eup %3242 }
 0x640   :  { %v2215_v33 = vmul.f32 %v3243_v22, %v2057_v11 }
 0x642   :  { %v2219_v43 = vrot.slane %v2215_v33, %v3367_v16  ;;  %v2246_v16 = vld [vmem:[%s4050_s10] sm:$0xff] }
 0x644   :  { %v2220_v34 = vmul.f32 %v2219_v43, %v3939_v1  ;;  %v2221_v49 = vmul.f32 %v2219_v43, %v3935_v57  ;;  %v2222_v14 = vmul.f32 %v2219_v43, %v3931_v56  ;;  %v2223_v60 = vmul.f32 %v2219_v43, %v3929_v55  ;;  %v2453_v56 = vld [vmem:[%s4051_s13] sm:$0x3]  ;;  %s3251_s13 = smov 127  }
 0x645   :  { %v2728_v57 = vld [vmem:[%s4052_s12] ss:$0 sm:$0xff] }
 0x646   :  { %v2230_v40 = vadd.f32 %v2727_v46, %v2220_v34  ;;  %v2231_v10 = vadd.f32 %v2727_v46, %v2221_v49  ;;  %v2232_v28 = vadd.f32 %v2727_v46, %v2222_v14  ;;  %v2233_v35 = vadd.f32 %v2727_v46, %v2223_v60 }
 0x648   :  { %vm2234_vm8 = vcmp.ge.f32.partialorder %v2230_v40, 0.0  ;;  %v2238_v59 = vmul.f32 0.2, %v2230_v40  ;;  %vm2235_vm9 = vcmp.ge.f32.partialorder %v2231_v10, 0.0  ;;  %v2239_v63 = vmul.f32 0.2, %v2231_v10 }
 0x649   :  { %vm2236_vm10 = vcmp.ge.f32.partialorder %v2232_v28, 0.0  ;;  %v2240_v26 = vmul.f32 0.2, %v2232_v28  ;;  %v2241_v61 = vmul.f32 0.2, %v2233_v35  ;;  %vm2237_vm11 = vcmp.ge.f32.partialorder %v2233_v35, 0.0 }
 0x64a   :  { %v2242_v32 = vsel %vm2234_vm8, %v2230_v40, %v2238_v59  ;;  %v2243_v30 = vsel %vm2235_vm9, %v2231_v10, %v2239_v63 }
 0x64b   :  { %v2250_v3 = vmul.f32 %v2246_v16, %v2242_v32  ;;  %v2251_v45 = vmul.f32 %v2247_v29, %v2243_v30  ;;  %v2244_v53 = vsel %vm2236_vm10, %v2232_v28, %v2240_v26  ;;  %v2245_v58 = vsel %vm2237_vm11, %v2233_v35, %v2241_v61 }
 0x64c   :  { %v2252_v39 = vmul.f32 %v2248_v51, %v2244_v53  ;;  %v2253_v25 = vmul.f32 %v2249_v27, %v2245_v58 }
 0x64d   :  { %3036 = vmatprep.mubr.f32.mxu1 %v2250_v3  ;;  %v3076_v7 = vpop.f32.mrf.mxu0 }
 0x64e   :  { %3037 = vmatmul.mubr.f32.vlgmr.msra.gmra.mxu1 %v2251_v45  ;;  %2438 = vrot.lane.b32.xlu1 %v3076_v7, %s3250_s23 }
 0x64f   :  { %3039 = vmatprep.mubr.f32.mxu1 %v2252_v39  ;;  %v2413_v36 = vpop.f32.mrf.mxu0 }
 0x651   :  { %v3079_v12 = vpop.f32.mrf.mxu0 }
 0x652   :  { %3040 = vmatmul.mubr.f32.gmra.mxu1 %v2253_v25  ;;  %2436 = vrot.lane.b32.xlu1 %v2413_v36, %s3250_s23 }
 0x653   :  { %2442 = vrot.lane.b32.xlu0 %v3079_v12, %s3250_s23  ;;  %3088 = vmatprep.mubr.msk.f32.mxu1 %vm3247_vm1, %v3246_v6  ;;  %v2423_v31 = vpop.f32.mrf.mxu0 }
 0x657   :  { %2440 = vrot.lane.b32.xlu0 %v2423_v31, %s3250_s23 }
 0x6c0   :  { %v2439_v48 = vpop.permute.xlu1 %2438 }
 0x6c4   :  { %v2437_v55 = vpop.permute.xlu1 %2436 }
 0x6c5   :  { %v2443_v50 = vpop.permute.xlu0 %2442 }
 0x6c9   :  { %v2441_v20 = vpop.permute.xlu0 %2440 }
 0x70e   :  { %v3038_v19 = vpop.f32.mrf.mxu1 }
 0x70f   :  { %v2450_v54 = vsel %vm2448_vm12, %v3038_v19, %v2439_v48 }
 0x710   :  { %v2320_v41 = vpop.f32.mrf.mxu1 }
 0x711   :  { %v2449_v0 = vsel %vm2448_vm12, %v2320_v41, %v2437_v55 }
 0x712   :  { %v3041_v37 = vpop.f32.mrf.mxu1 }
 0x713   :  { %v2452_v23 = vsel %vm2448_vm12, %v3041_v37, %v2443_v50 }
 0x714   :  { %v2330_v52 = vpop.f32.mrf.mxu1  ;;  %3081 = vmatpush3.msra.mxu1 %v2452_v23 }
 0x715   :  { %v2451_v38 = vsel %vm2448_vm12, %v2330_v52, %v2441_v20  ;;  %3082 = vmatprep.subr.mxu1 %v3246_v6 }
 0x716   :  { %3083 = vmatpush3.msra.mxu1 %v2451_v38 }
 0x717   :  { %3084 = vmatprep.subr.mxu1 %v3246_v6 }
 0x718   :  { %3085 = vmatpush3.msra.mxu1 %v2450_v54 }
 0x719   :  { %3086 = vmatprep.subr.mxu1 %v3246_v6 }
 0x71a   :  { %3087 = vmatpush3.msra.mxu1 %v2449_v0 }
 0x71b   :  { %3089 = vmatmul.mubr.msk.f32.vlgmr.msra.gmra.mxu1 %vm154_vm2, %v2453_v56 }
 0x7db   :  { %v2530_v62 = vpop.f32.mrf.mxu1 }
 0x7dc   :  { %v2531_v1 = vadd.f32 %v2728_v57, %v2530_v62 }
 0x7dd   :  { %v3090_v2 = vpop.f32.mrf.mxu1 }
 0x7de   :  { %v2534_v42 = vmul.f32 0.5, %v2531_v1 }
 0x7e0   :  { %3244 = vtanh.f32 %v2534_v42 }
 0x7ed   :  { %v3245_v21 = vpop.eup %3244 }
 0x7ee   :  { %v2536_v4 = vadd.f32 1.0, %v3245_v21 }
 0x7f0   :  { %v2537_v24 = vmul.f32 0.5, %v2536_v4 }
 0x7f2   :  { %2541 = vrot.lane.b32.xlu0 %v2537_v24, %s3251_s13  ;;  %2539 = vst.msk [vmem:[%s4053_s14] sm:$0x3] %vm2538_vm13, %v2537_v24 }
 0x864   :  { %v2542_v6 = vpop.permute.xlu0 %2541 }
 0x865   :  { %2544 = vst.msk [vmem:[%s4054_s15] sm:$0x3] %vm2538_vm13, %v2542_v6 }

</bundles_post_ra>
